<compile_context>
chip_gen: v5e
topology: v5e:2x2
jax: 0.10.0
libtpu: 0.0.40
codegen_flags: <defaults>
</compile_context>

<pallas_src>
import jax
import jax.numpy as jnp
from jax.experimental import pallas as pl
from jax.experimental.pallas import tpu as pltpu


def mlp_kernel(xt_ref, w1_ref, b1_ref, w2_ref, b2_ref, w3_ref, b3_ref,
               w4_ref, b4_ref, o_ref):
    """Fused 4-layer MLP in (features, batch) orientation.

    xt_ref : (F, bt)            bf16   (batch on lanes)
    wN_ref : (out_N, in_N)      bf16   (native PyTorch weight layout)
    bN_ref : (out_N, 1)         f32    (broadcasts across the lane/batch axis)
    o_ref  : (1, bt)            f32    lane-dense output slab
    Dropout layers are identity at inference and are folded away.
    """
    cdt = w1_ref.dtype  # MXU operand dtype (bf16)

    # Layer 1: Linear(F, 256) + ReLU        -> (256, bt), f32 accumulation
    h = jnp.dot(w1_ref[...], xt_ref[...], preferred_element_type=jnp.float32)
    h = jnp.maximum(h + b1_ref[...], 0.0)
    # Layer 2: Linear(256, 128) + ReLU      -> (128, bt)
    h = jnp.dot(w2_ref[...], h.astype(cdt), preferred_element_type=jnp.float32)
    h = jnp.maximum(h + b2_ref[...], 0.0)
    # Layer 3: Linear(128, 64) + ReLU       -> (64, bt)
    h = jnp.dot(w3_ref[...], h.astype(cdt), preferred_element_type=jnp.float32)
    h = jnp.maximum(h + b3_ref[...], 0.0)
    # Layer 4: Linear(64, 1)                -> (1, bt) lane-dense
    out = jnp.dot(w4_ref[...], h.astype(cdt), preferred_element_type=jnp.float32)
    o_ref[...] = (out + b4_ref[...]).astype(o_ref.dtype)


def mlp_classifier_forward(x, params, *, batch_tile=256, compute_dtype=jnp.bfloat16):
    """Forward pass of MlpClassifier. x: (B, F) float32 -> (B, 1) float32.

    params: [(w1, b1), ..., (w4, b4)] with w in PyTorch (out, in) layout and
            b as an (out, 1) column.
    """
    (w1, b1), (w2, b2), (w3, b3), (w4, b4) = params
    B, F = x.shape
    bt = batch_tile
    b_pad = bt * pl.cdiv(B, bt)

    # Layout plumbing (outside the kernel): pad batch to a tile multiple, cast MXU
    # operands to bf16, and put batch on the minor (lane) axis.
    x_t = jnp.pad(x, ((0, b_pad - B), (0, 0))).astype(compute_dtype).T  # (F, b_pad)
    ws = [w.astype(compute_dtype) for w in (w1, w2, w3, w4)]
    bs = [b.astype(jnp.float32) for b in (b1, b2, b3, b4)]

    def resident(arr):
        # Full-array block with a grid-invariant index_map: DMA'd once, stays in VMEM.
        nd = arr.ndim
        return pl.BlockSpec(arr.shape, lambda i: (0,) * nd)

    out_t = pl.pallas_call(
        mlp_kernel,
        out_shape=jax.ShapeDtypeStruct((1, b_pad), jnp.float32),
        grid_spec=pl.GridSpec(
            grid=(b_pad // bt,),
            in_specs=[
                pl.BlockSpec((F, bt), lambda i: (0, i)),   # x tile (lane-dense)
                resident(ws[0]), resident(bs[0]),
                resident(ws[1]), resident(bs[1]),
                resident(ws[2]), resident(bs[2]),
                resident(ws[3]), resident(bs[3]),
            ],
            out_specs=pl.BlockSpec((1, bt), lambda i: (0, i)),
        ),
        compiler_params=pltpu.CompilerParams(
            dimension_semantics=("parallel",),   # batch axis shards across TCs (v7x)
        ),
    )(x_t, ws[0], bs[0], ws[1], bs[1], ws[2], bs[2], ws[3], bs[3])

    # Drop padded rows and restore the PyTorch (B, 1) output shape.
    return out_t[0, :B].reshape(B, 1)


def init_params(key, num_features):
    """PyTorch nn.Linear default init: U(-1/sqrt(in), 1/sqrt(in)); w is (out, in)."""
    dims = [num_features, 256, 128, 64, 1]
    params = []
    for d_in, d_out in zip(dims[:-1], dims[1:]):
        key, kw, kb = jax.random.split(key, 3)
        bound = 1.0 / (d_in ** 0.5)
        w = jax.random.uniform(kw, (d_out, d_in), jnp.float32, -bound, bound)
        b = jax.random.uniform(kb, (d_out, 1), jnp.float32, -bound, bound)
        params.append((w, b))
    return params


def reference_forward(x, params, compute_dtype=jnp.bfloat16):
    """Pure-JAX reference with the same bf16-operand / f32-accumulate numerics."""
    h = x.astype(jnp.float32)
    for i, (w, b) in enumerate(params):
        h = jnp.dot(h.astype(compute_dtype), w.astype(compute_dtype).T,
                    preferred_element_type=jnp.float32) + b[:, 0]
        if i < len(params) - 1:
            h = jnp.maximum(h, 0.0)
    return h  # (B, 1)


if __name__ == "__main__":
    key = jax.random.PRNGKey(0)
    k_x, k_p = jax.random.split(key)

    batch = 300          # not a tile multiple: exercises host padding; pads to 512
    num_features = 32    # small synthetic feature count

    x = jax.random.normal(k_x, (batch, num_features), jnp.float32)
    params = init_params(k_p, num_features)

    out = mlp_classifier_forward(x, params, batch_tile=256)
    out = jax.block_until_ready(out)

    ref = reference_forward(x, params)
    assert out.shape == (batch, 1)
    assert jnp.allclose(out, ref, atol=2e-3, rtol=2e-3), "mismatch vs JAX reference"

    print("KERNEL_OK")
</pallas_src>

<mosaic_0001>
module attributes {stable_mosaic.version = 11 : i64} {
  func.func @mlp_kernel(%arg0: i32, %arg1: memref<32x256xbf16, #tpu.memory_space<vmem>>, %arg2: memref<256x32xbf16, #tpu.memory_space<vmem>>, %arg3: memref<256x1xf32, #tpu.memory_space<vmem>>, %arg4: memref<128x256xbf16, #tpu.memory_space<vmem>>, %arg5: memref<128x1xf32, #tpu.memory_space<vmem>>, %arg6: memref<64x128xbf16, #tpu.memory_space<vmem>>, %arg7: memref<64x1xf32, #tpu.memory_space<vmem>>, %arg8: memref<1x64xbf16, #tpu.memory_space<vmem>>, %arg9: memref<1x1xf32, #tpu.memory_space<vmem>>, %arg10: memref<1x256xf32, #tpu.memory_space<vmem>>) attributes {dimension_semantics = [#tpu.dimension_semantics<parallel>], iteration_bounds = array<i64: 2>, scalar_prefetch = 0 : i64, scratch_operands = 0 : i64, tpu.core_type = #tpu.core_type<tc>, window_params = [{transform_indices = @transform_0, window_bounds = array<i64: 32, 256>}, {pipeline_mode = #tpu.pipeline_mode<synchronous>, transform_indices = @transform_1, window_bounds = array<i64: 256, 32>}, {pipeline_mode = #tpu.pipeline_mode<synchronous>, transform_indices = @transform_2, window_bounds = array<i64: 256, 1>}, {pipeline_mode = #tpu.pipeline_mode<synchronous>, transform_indices = @transform_3, window_bounds = array<i64: 128, 256>}, {pipeline_mode = #tpu.pipeline_mode<synchronous>, transform_indices = @transform_4, window_bounds = array<i64: 128, 1>}, {pipeline_mode = #tpu.pipeline_mode<synchronous>, transform_indices = @transform_5, window_bounds = array<i64: 64, 128>}, {pipeline_mode = #tpu.pipeline_mode<synchronous>, transform_indices = @transform_6, window_bounds = array<i64: 64, 1>}, {pipeline_mode = #tpu.pipeline_mode<synchronous>, transform_indices = @transform_7, window_bounds = array<i64: 1, 64>}, {pipeline_mode = #tpu.pipeline_mode<synchronous>, transform_indices = @transform_8, window_bounds = array<i64: 1, 1>}, {transform_indices = @transform_9, window_bounds = array<i64: 1, 256>}]} {
    %c0 = arith.constant 0 : index
    %c0_0 = arith.constant 0 : index
    %0 = vector.load %arg2[%c0, %c0_0] : memref<256x32xbf16, #tpu.memory_space<vmem>>, vector<256x32xbf16>
    %c0_1 = arith.constant 0 : index
    %c0_2 = arith.constant 0 : index
    %1 = vector.load %arg1[%c0_1, %c0_2] : memref<32x256xbf16, #tpu.memory_space<vmem>>, vector<32x256xbf16>
    %cst = arith.constant dense<0.000000e+00> : vector<256x256xf32>
    %2 = tpu.matmul %0, %1, %cst {dimension_numbers = #tpu.dot_dimension_numbers<[1], [0], [0], [1], [0, 0, 1, 1], [], []>} : vector<256x32xbf16>, vector<32x256xbf16>, vector<256x256xf32> -> vector<256x256xf32>
    %c0_3 = arith.constant 0 : index
    %c0_4 = arith.constant 0 : index
    %3 = vector.load %arg3[%c0_3, %c0_4] : memref<256x1xf32, #tpu.memory_space<vmem>>, vector<256x1xf32>
    %4 = vector.broadcast %3 : vector<256x1xf32> to vector<256x256xf32>
    %5 = arith.addf %2, %4 : vector<256x256xf32>
    %cst_5 = arith.constant 0.000000e+00 : f32
    %6 = vector.broadcast %cst_5 : f32 to vector<256x256xf32>
    %7 = arith.maximumf %5, %6 : vector<256x256xf32>
    %c0_6 = arith.constant 0 : index
    %c0_7 = arith.constant 0 : index
    %8 = vector.load %arg4[%c0_6, %c0_7] : memref<128x256xbf16, #tpu.memory_space<vmem>>, vector<128x256xbf16>
    %9 = arith.truncf %7 : vector<256x256xf32> to vector<256x256xbf16>
    %cst_8 = arith.constant dense<0.000000e+00> : vector<128x256xf32>
    %10 = tpu.matmul %8, %9, %cst_8 {dimension_numbers = #tpu.dot_dimension_numbers<[1], [0], [0], [1], [0, 0, 1, 1], [], []>} : vector<128x256xbf16>, vector<256x256xbf16>, vector<128x256xf32> -> vector<128x256xf32>
    %c0_9 = arith.constant 0 : index
    %c0_10 = arith.constant 0 : index
    %11 = vector.load %arg5[%c0_9, %c0_10] : memref<128x1xf32, #tpu.memory_space<vmem>>, vector<128x1xf32>
    %12 = vector.broadcast %11 : vector<128x1xf32> to vector<128x256xf32>
    %13 = arith.addf %10, %12 : vector<128x256xf32>
    %cst_11 = arith.constant 0.000000e+00 : f32
    %14 = vector.broadcast %cst_11 : f32 to vector<128x256xf32>
    %15 = arith.maximumf %13, %14 : vector<128x256xf32>
    %c0_12 = arith.constant 0 : index
    %c0_13 = arith.constant 0 : index
    %16 = vector.load %arg6[%c0_12, %c0_13] : memref<64x128xbf16, #tpu.memory_space<vmem>>, vector<64x128xbf16>
    %17 = arith.truncf %15 : vector<128x256xf32> to vector<128x256xbf16>
    %cst_14 = arith.constant dense<0.000000e+00> : vector<64x256xf32>
    %18 = tpu.matmul %16, %17, %cst_14 {dimension_numbers = #tpu.dot_dimension_numbers<[1], [0], [0], [1], [0, 0, 1, 1], [], []>} : vector<64x128xbf16>, vector<128x256xbf16>, vector<64x256xf32> -> vector<64x256xf32>
    %c0_15 = arith.constant 0 : index
    %c0_16 = arith.constant 0 : index
    %19 = vector.load %arg7[%c0_15, %c0_16] : memref<64x1xf32, #tpu.memory_space<vmem>>, vector<64x1xf32>
    %20 = vector.broadcast %19 : vector<64x1xf32> to vector<64x256xf32>
    %21 = arith.addf %18, %20 : vector<64x256xf32>
    %cst_17 = arith.constant 0.000000e+00 : f32
    %22 = vector.broadcast %cst_17 : f32 to vector<64x256xf32>
    %23 = arith.maximumf %21, %22 : vector<64x256xf32>
    %c0_18 = arith.constant 0 : index
    %c0_19 = arith.constant 0 : index
    %24 = vector.load %arg8[%c0_18, %c0_19] : memref<1x64xbf16, #tpu.memory_space<vmem>>, vector<1x64xbf16>
    %25 = arith.truncf %23 : vector<64x256xf32> to vector<64x256xbf16>
    %cst_20 = arith.constant dense<0.000000e+00> : vector<1x256xf32>
    %26 = tpu.matmul %24, %25, %cst_20 {dimension_numbers = #tpu.dot_dimension_numbers<[1], [0], [0], [1], [0, 0, 1, 1], [], []>} : vector<1x64xbf16>, vector<64x256xbf16>, vector<1x256xf32> -> vector<1x256xf32>
    %c0_21 = arith.constant 0 : index
    %c0_22 = arith.constant 0 : index
    %27 = vector.load %arg9[%c0_21, %c0_22] : memref<1x1xf32, #tpu.memory_space<vmem>>, vector<1x1xf32>
    %28 = vector.broadcast %27 : vector<1x1xf32> to vector<1x256xf32>
    %29 = arith.addf %26, %28 : vector<1x256xf32>
    %c0_23 = arith.constant 0 : index
    %c0_24 = arith.constant 0 : index
    %30 = vector.load %arg10[%c0_23, %c0_24] : memref<1x256xf32, #tpu.memory_space<vmem>>, vector<1x256xf32>
    tpu.vector_store %arg10[%c0_23, %c0_24], %29 {strides = array<i32>} : memref<1x256xf32, #tpu.memory_space<vmem>>, vector<1x256xf32>,
    return
  }
  func.func @transform_0(%arg0: i32) -> (i32, i32) {
    %c0_i32 = arith.constant 0 : i32
    %c0_i32_0 = arith.constant 0 : i32
    return %c0_i32, %arg0 : i32, i32
  }
  func.func @transform_1(%arg0: i32) -> (i32, i32) {
    %c0_i32 = arith.constant 0 : i32
    %c0_i32_0 = arith.constant 0 : i32
    %c0_i32_1 = arith.constant 0 : i32
    return %c0_i32, %c0_i32_0 : i32, i32
  }
  func.func @transform_2(%arg0: i32) -> (i32, i32) {
    %c0_i32 = arith.constant 0 : i32
    %c0_i32_0 = arith.constant 0 : i32
    %c0_i32_1 = arith.constant 0 : i32
    return %c0_i32, %c0_i32_0 : i32, i32
  }
  func.func @transform_3(%arg0: i32) -> (i32, i32) {
    %c0_i32 = arith.constant 0 : i32
    %c0_i32_0 = arith.constant 0 : i32
    %c0_i32_1 = arith.constant 0 : i32
    return %c0_i32, %c0_i32_0 : i32, i32
  }
  func.func @transform_4(%arg0: i32) -> (i32, i32) {
    %c0_i32 = arith.constant 0 : i32
    %c0_i32_0 = arith.constant 0 : i32
    %c0_i32_1 = arith.constant 0 : i32
    return %c0_i32, %c0_i32_0 : i32, i32
  }
  func.func @transform_5(%arg0: i32) -> (i32, i32) {
    %c0_i32 = arith.constant 0 : i32
    %c0_i32_0 = arith.constant 0 : i32
    %c0_i32_1 = arith.constant 0 : i32
    return %c0_i32, %c0_i32_0 : i32, i32
  }
  func.func @transform_6(%arg0: i32) -> (i32, i32) {
    %c0_i32 = arith.constant 0 : i32
    %c0_i32_0 = arith.constant 0 : i32
    %c0_i32_1 = arith.constant 0 : i32
    return %c0_i32, %c0_i32_0 : i32, i32
  }
  func.func @transform_7(%arg0: i32) -> (i32, i32) {
    %c0_i32 = arith.constant 0 : i32
    %c0_i32_0 = arith.constant 0 : i32
    %c0_i32_1 = arith.constant 0 : i32
    return %c0_i32, %c0_i32_0 : i32, i32
  }
  func.func @transform_8(%arg0: i32) -> (i32, i32) {
    %c0_i32 = arith.constant 0 : i32
    %c0_i32_0 = arith.constant 0 : i32
    %c0_i32_1 = arith.constant 0 : i32
    return %c0_i32, %c0_i32_0 : i32, i32
  }
  func.func @transform_9(%arg0: i32) -> (i32, i32) {
    %c0_i32 = arith.constant 0 : i32
    %c0_i32_0 = arith.constant 0 : i32
    return %c0_i32, %arg0 : i32, i32
  }
}

</mosaic_0001>

<bundles_post_ra>
// kernel: tpu_custom_call.1
= control target key start
LH: loop header
LB: loop body
LE: loop exit
PB: predicated region body
PF: predicated region fallthrough
CT: control target
= control target key end

     0   :  { %s3009_s0 = inlined_call_operand.vmem [shape: bf16[32,512], index: 0, kind: input, shape index: {}]   ;;  %s3010_s1 = inlined_call_operand.vmem [shape: bf16[256,32], index: 1, kind: input, shape index: {}]   ;;  %s3011_s2 = inlined_call_operand.vmem [shape: f32[256,1], index: 2, kind: input, shape index: {}]   ;;  %s3012_s3 = inlined_call_operand.vmem [shape: bf16[128,256], index: 3, kind: input, shape index: {}]   ;;  %s3013_s4 = inlined_call_operand.vmem [shape: f32[128,1], index: 4, kind: input, shape index: {}]   ;;  %s3014_s5 = inlined_call_operand.vmem [shape: bf16[64,128], index: 5, kind: input, shape index: {}]   ;;  %s3015_s6 = inlined_call_operand.vmem [shape: f32[64,1], index: 6, kind: input, shape index: {}]   ;;  %s3016_s7 = inlined_call_operand.vmem [shape: bf16[1,64], index: 7, kind: input, shape index: {}]   ;;  %s3017_s8 = inlined_call_operand.<no memory space> [shape: f32[1,1], index: 8, kind: input, shape index: {}]   ;;  %s3018_s9 = inlined_call_operand.hbm [shape: f32[1,512], index: 9, kind: output, shape index: {}]  }
   0x1   :  { %v14_v0 = vstv %s3017_s8 }
   0x2   :  { %15 = vst [vmem:[#allocation2] sm:$0x1] %v14_v0 }
   0x3   :  { %16 = vsyncpa [#allocation5], 0 }
   0x4   :  { %18 = vsyncpa [#allocation5 + $0x1], 0  ;;  %s2172_s11 = smov 0   ;;  %s2174_s12 = smov 0  }
   0x5   :  { %s2176_s13 = smov 0   ;;  %s2178_s14 = smov 0  }
   0x6 LB: > { %s1762_s8 = sadd.s32 4294967295, %s2116_s14   ;;  %s1763_s15 = sadd.s32 4294967294, %s2116_s14   ;;  %s2116_s14 = sphi %s2178_s14, %s3024_s14   ;;  %s2112_s13 = sphi %s2176_s13, %s3023_s13   ;;  %s2108_s12 = sphi %s2174_s12, %s3022_s12   ;;  %s2104_s11 = sphi %s2172_s11, %s3021_s11  }
   0x7   : > { %s2195_s16 = sadd.s32 1, %s2116_s14   ;;  %s31_s17 = sadd.s32 1, %s2112_s13 }
   0x8   : > { %s28_s18 = ssub.s32 %s2116_s14, %s2195_s16  ;;  %p38_p0 = scmp.ne.s32.totalorder %s2112_s13, %s2108_s12 }
   0x9   : > { %p29_p1 = scmp.eq.s32.totalorder %s28_s18, 0  ;;  %p39_p2 = scmp.eq.s32.totalorder %s2116_s14, 0 }
   0xa   : > { %p236_p3 = scmp.eq.s32.totalorder %s1762_s8, 1  ;;  %p241_p4 = scmp.ne.s32.totalorder %s2108_s12, %s2104_s11 }
   0xb   : > { %s2208_s19 = scalar_select %p29_p1, %s2112_s13, %s31_s17  }
   0xc   : > { %p40_p5 = por %p39_p2, %p38_p0  ;;  %p2210_p6 = por %p236_p3, %p38_p0 }
   0xd   : > { %p242_p7 = scmp.eq.s32.totalorder %s1763_s15, 1  ;;  %p1765_p9 = scmp.ge.s32.totalorder %s2116_s14, 2 }
   0xf   : > { %p2214_p8 = por %p242_p7, %p241_p4  ;;  %282 = sbr.rel (%p1765_p9) target bundleno = 28 (0x1c), region = 48 }
  0x14   : > { %285 = sbr.rel (!%p40_p5) target bundleno = 28 (0x1c), region = 52  ;;  %s287_s22 = sand.u32 (%p40_p5), 1, %s2112_s13  }
  0x15   : > { %s1970_s23 = sshll.u32 (%p40_p5), %s2116_s14, 3  ;;  %s1766_s24 = sshll.u32 (%p40_p5), %s287_s22, 5 }
  0x16   : > { %s292_s27 = scalar_lea.vmem (%p40_p5), %s3009_s0, %s1970_s23  ;;  %s289_s28 = scalar_lea.vmem (%p40_p5), [#allocation3], %s1766_s24 }
  0x17   : > { %v327_v1 = vld [vmem:[%s292_s27] sm:$0xff] (%p40_p5)  ;;  %v329_v2 = vld [vmem:[%s292_s27 + $0x10] sm:$0xff] (%p40_p5) }
  0x18   : > { %v331_v3 = vld [vmem:[%s292_s27 + $0x20] sm:$0xff] (%p40_p5)  ;;  %328 = vst [vmem:[%s289_s28] sm:$0xff] (%p40_p5), %v327_v1  ;;  %v333_v4 = vld [vmem:[%s292_s27 + $0x30] sm:$0xff] (%p40_p5) }
  0x19   : > { %330 = vst [vmem:[%s289_s28 + $0x8] sm:$0xff] %v329_v2 }
  0x1a   : > { %332 = vst [vmem:[%s289_s28 + $0x10] sm:$0xff] %v331_v3 }
  0x1b   : > { %334 = vst [vmem:[%s289_s28 + $0x18] sm:$0xff] %v333_v4 }
  0x1c PF: > { %p1769_p10 = scmp.ge.s32.totalorder %s2116_s14, 1  ;;  %p339_p11 = scmp.lt.s32.totalorder %s2116_s14, 3 }
  0x1e   : > { %p340_p12 = pnand %p1769_p10, %p339_p11 }
  0x1f   : > { %s2238_s22 = sand.u32 (!%p340_p12), 1, %s2108_s12   ;;  %s1967_s18 = sshll.u32 (!%p340_p12), %s1762_s8, 1 }
  0x20   : > { %343 = sbr.rel (%p340_p12) target bundleno = 1220 (0x4c4), region = 90  ;;  %s1770_s23 = sshll.u32 (!%p340_p12), %s2238_s22, 5 }
  0x21   : > { %s348_s24 = scalar_lea.vmem (!%p340_p12), [#allocation3], %s1770_s23  ;;  %s1771_s17 = sshll.u32 (!%p340_p12), %s2238_s22, 1 }
  0x22   : > { %s1693_s25 = scalar_lea.hbm (!%p340_p12), %s3018_s9, %s1967_s18  ;;  %s380_s26 = scalar_lea.vmem (!%p340_p12), [#allocation4], %s1771_s17 }
  0x23   : > { %s1695_s27 = sshll.u32 (!%p340_p12), %s380_s26, 4  ;;  %s1697_s28 = sshll.u32 (!%p340_p12), %s1693_s25, 4  ;;  %s1696_s27 = int_to_ptr.vmem [resolvable:$true] %s1695_s27  ;;  %s1698_s28 = int_to_ptr.hbm [resolvable:$true] %s1697_s28 }
  0x24   : > { %s1683_s8 = scalar_lea.sflag (!%p340_p12), [#allocation5], %s2238_s22  ;;  %s2068_s29 = sshra.s32 (!%p340_p12), %s1698_s28, 4  ;;  %s2069_s29 = int_to_ptr.hbm [resolvable:$true] %s2068_s29 }
  0x25   : > { %v450_v5 = vld [vmem:[%s3011_s2 + $0xf0] sm:$0xff]  ;;  %v432_v7 = vld [vmem:[%s3011_s2 + $0x60] sm:$0xff]  ;;  %v2118_v8 = vmov 0   ;;  %v1990_v10 = vld [vmem:[%s348_s24 + $0x14] sm:$0xf0]  ;;  %vm712_vm0 = vcmask 261120   ;;  %p2075_p2 = scmp.lt.s32.totalorder %s2069_s29, %s3018_s9 }
  0x26   : > { %v434_v6 = vld [vmem:[%s3011_s2 + $0x70] sm:$0xff]  ;;  %2053 = vset.pattern.permute.xlu2 %v2118_v8  ;;  %2052 = vset.pattern.permute.xlu1 %v2118_v8  ;;  %v1848_v13 = vld [vmem:[%s348_s24 + $0x18] sm:$0xf0]  ;;  %v1838_v14 = vld [vmem:[%s348_s24] sm:$0xf]  ;;  %vm1641_vm1 = vcmask 523264  }
  0x27   : > { %2051 = vset.pattern.permute.xlu0 %v2118_v8  ;;  %604 = vperm.xlu1 %2052, %v450_v5   ;;  %v1846_v9 = vld [vmem:[%s348_s24 + $0x10] sm:$0xf]  ;;  %v1989_v11 = vld [vmem:[%s348_s24 + $0x14] sm:$0xf]  ;;  %v1988_v15 = vld [vmem:[%s348_s24 + $0x4] sm:$0xf0] }
  0x28   : > { %524 = vperm.xlu0 %2051, %v434_v6   ;;  %514 = vperm.xlu2 %2053, %v432_v7   ;;  %v1847_v12 = vor.u32 %v1990_v10, %v1846_v9  ;;  %v1851_v16 = vor.u32 %v1989_v11, %v1848_v13  ;;  %v1987_v17 = vld [vmem:[%s348_s24 + $0x4] sm:$0xf]  ;;  %v1840_v18 = vld [vmem:[%s348_s24 + $0x8] sm:$0xf0]  ;;  %v1839_v19 = vor.u32 %v1988_v15, %v1838_v14  ;;  %v451_v20 = vld [vmem:[%s3011_s2 + $0xf8] sm:$0xff]  ;;  %vm1674_vm2 = vcmask 1040384  }
  0x29   : > { %v435_v21 = vld [vmem:[%s3011_s2 + $0x78] sm:$0xff]  ;;  %v433_v22 = vld [vmem:[%s3011_s2 + $0x68] sm:$0xff]  ;;  %v1843_v23 = vor.u32 %v1987_v17, %v1840_v18  ;;  %v1971_v24 = vld [vmem:[%s3010_s1] sm:$0xff]  ;;  %s2070_s30 = scalar_lea.hbm %s2069_s29, 2  ;;  %s2074_s17 = scalar_lea.hbm %s3018_s9, 4 }
  0x2a   : > { %767 = vmatpush.bf16.msra.mxu0 %v1847_v12  ;;  %856 = vmatpush.bf16.msra.mxu1 %v1851_v16  ;;  %v449_v25 = vld [vmem:[%s3011_s2 + $0xe8] sm:$0xff]  ;;  %v448_v26 = vld [vmem:[%s3011_s2 + $0xe0] sm:$0xff]  ;;  %v430_v27 = vld [vmem:[%s3011_s2 + $0x50] sm:$0xff]  ;;  %p2071_p13 = scmp.ne.s32.totalorder %s2069_s29, %s2070_s30  ;;  %p2076_p3 = scmp.lt.s32.totalorder %s2074_s17, %s2070_s30 }
  0x2b   : > { %v446_v28 = vld [vmem:[%s3011_s2 + $0xd0] sm:$0xff]  ;;  %v431_v29 = vld [vmem:[%s3011_s2 + $0x58] sm:$0xff]  ;;  %v1972_v31 = vld [vmem:[%s3010_s1 + $0x8] sm:$0xff] }
  0x2c   : > { %v447_v30 = vld [vmem:[%s3011_s2 + $0xd8] sm:$0xff]  ;;  %v429_v32 = vld [vmem:[%s3011_s2 + $0x48] sm:$0xff]  ;;  %v444_v33 = vld [vmem:[%s3011_s2 + $0xc0] sm:$0xff]  ;;  %p2072_p0 = pnand %p2071_p13, %p2210_p6  ;;  %p2077_p4 = por %p2076_p3, %p2075_p2 }
  0x2d   : > { %v428_v34 = vld [vmem:[%s3011_s2 + $0x40] sm:$0xff]  ;;  %v426_v35 = vld [vmem:[%s3011_s2 + $0x30] sm:$0xff]  ;;  %v445_v36 = vld [vmem:[%s3011_s2 + $0xc8] sm:$0xff] }
  0x2e   : > { %768 = vmatpush.bf16.msra.mxu0 %v1839_v19  ;;  %857 = vmatpush.bf16.msra.mxu1 %v1843_v23  ;;  %v427_v37 = vld [vmem:[%s3011_s2 + $0x38] sm:$0xff]  ;;  %v1973_v38 = vld [vmem:[%s3010_s1 + $0x10] sm:$0xff]  ;;  %v424_v41 = vld [vmem:[%s3011_s2 + $0x20] sm:$0xff]  ;;  %p2073_p1 = pneg %p2072_p0 }
  0x2f   : > { %609 = vperm.xlu1 %2052, %v451_v20   ;;  %v443_v39 = vld [vmem:[%s3011_s2 + $0xb8] sm:$0xff]  ;;  %v442_v40 = vld [vmem:[%s3011_s2 + $0xb0] sm:$0xff]  ;;  %v440_v42 = vld [vmem:[%s3011_s2 + $0xa0] sm:$0xff] }
  0x30   : > { %529 = vperm.xlu0 %2051, %v435_v21   ;;  %519 = vperm.xlu2 %2053, %v433_v22   ;;  %v425_v43 = vld [vmem:[%s3011_s2 + $0x28] sm:$0xff]  ;;  %v1974_v45 = vld [vmem:[%s3010_s1 + $0x18] sm:$0xff]  ;;  %v438_v47 = vld [vmem:[%s3011_s2 + $0x90] sm:$0xff]  ;;  %p2078_p5 = pnand %p2077_p4, %p2073_p1 }
  0x31   : > { %1852 = vmatmul.msk.bf16.vlgmr.msra.gmra.mxu0 %vm712_vm0, %v1971_v24  ;;  %1868 = vmatmul.msk.bf16.vlgmr.msra.gmra.mxu1 %vm712_vm0, %v1971_v24  ;;  %v441_v44 = vld [vmem:[%s3011_s2 + $0xa8] sm:$0xff]  ;;  %v423_v46 = vld [vmem:[%s3011_s2 + $0x18] sm:$0xff]  ;;  %v422_v48 = vld [vmem:[%s3011_s2 + $0x10] sm:$0xff] }
  0x32   : > { %v420_v49 = vld [vmem:[%s3011_s2] sm:$0xff]  ;;  %v421_v50 = vld [vmem:[%s3011_s2 + $0x8] sm:$0xff]  ;;  %v1977_v55 = vld [vmem:[%s3010_s1 + $0x30] sm:$0xff] }
  0x33   : > { %v1975_v51 = vld [vmem:[%s3010_s1 + $0x20] sm:$0xff]  ;;  %v1976_v52 = vld [vmem:[%s3010_s1 + $0x28] sm:$0xff]  ;;  %v439_v56 = vld [vmem:[%s3011_s2 + $0x98] sm:$0xff] }
  0x34   : > { %v436_v60 = vld [vmem:[%s3011_s2 + $0x80] sm:$0xff]  ;;  %v1978_v61 = vld [vmem:[%s3010_s1 + $0x38] sm:$0xff]  ;;  %v437_v1 = vld [vmem:[%s3011_s2 + $0x88] sm:$0xff] }
  0x35   : > { %v1066_v5 = vld [vmem:[%s3013_s4 + $0x78] sm:$0xff]  ;;  %v1063_v6 = vld [vmem:[%s3013_s4 + $0x60] sm:$0xff]  ;;  %v1061_v12 = vld [vmem:[%s3013_s4 + $0x50] sm:$0xff] }
  0x36   : > { %v1979_v7 = vld [vmem:[%s3010_s1 + $0x40] sm:$0xff]  ;;  %v1062_v13 = vld [vmem:[%s3013_s4 + $0x58] sm:$0xff]  ;;  %v1060_v19 = vld [vmem:[%s3013_s4 + $0x48] sm:$0xff] }
  0x37   : > { %599 = vperm.xlu1 %2052, %v449_v25   ;;  %v1057_v20 = vld [vmem:[%s3013_s4 + $0x30] sm:$0xff]  ;;  %v1980_v23 = vld [vmem:[%s3010_s1 + $0x48] sm:$0xff] }
  0x38   : > { %594 = vperm.xlu0 %2051, %v448_v26   ;;  %504 = vperm.xlu2 %2053, %v430_v27   ;;  %v1065_v21 = vld [vmem:[%s3013_s4 + $0x70] sm:$0xff] }
  0x3f   : > { %584 = vperm.xlu1 %2052, %v446_v28   ;;  %v1055_v28 = vld [vmem:[%s3013_s4 + $0x20] sm:$0xff] }
  0x40   : > { %509 = vperm.xlu0 %2051, %v431_v29   ;;  %589 = vperm.xlu2 %2053, %v447_v30   ;;  %v1056_v29 = vld [vmem:[%s3013_s4 + $0x28] sm:$0xff] }
  0x41   : > { %1853 = vmatmul.msk.bf16.gmra.mxu0 %vm712_vm0, %v1972_v31  ;;  %1869 = vmatmul.msk.bf16.gmra.mxu1 %vm712_vm0, %v1972_v31  ;;  %v1064_v30 = vld [vmem:[%s3013_s4 + $0x68] sm:$0xff] }
  0x47   : > { %499 = vperm.xlu1 %2052, %v429_v32  }
  0x48   : > { %574 = vperm.xlu2 %2053, %v444_v33   ;;  %494 = vperm.xlu0 %2051, %v428_v34  }
  0x4f   : > { %484 = vperm.xlu1 %2052, %v426_v35  }
  0x50   : > { %579 = vperm.xlu0 %2051, %v445_v36   ;;  %489 = vperm.xlu2 %2053, %v427_v37   ;;  %v1054_v36 = vld [vmem:[%s3013_s4 + $0x18] sm:$0xff]  ;;  %v1051_v37 = vld [vmem:[%s3013_s4] sm:$0xff] }
  0x51   : > { %1854 = vmatmul.msk.bf16.gmra.mxu0 %vm712_vm0, %v1973_v38  ;;  %1870 = vmatmul.msk.bf16.gmra.mxu1 %vm712_vm0, %v1973_v38  ;;  %v1059_v38 = vld [vmem:[%s3013_s4 + $0x40] sm:$0xff] }
  0x57   : > { %569 = vperm.xlu1 %2052, %v443_v39   ;;  %v1981_v39 = vld [vmem:[%s3010_s1 + $0x50] sm:$0xff] }
  0x58   : > { %564 = vperm.xlu0 %2051, %v442_v40   ;;  %474 = vperm.xlu2 %2053, %v424_v41  }
  0x5f   : > { %554 = vperm.xlu1 %2052, %v440_v42  }
  0x60   : > { %479 = vperm.xlu0 %2051, %v425_v43   ;;  %559 = vperm.xlu2 %2053, %v441_v44   ;;  %v1485_v44 = vld [vmem:[%s3015_s6 + $0x30] sm:$0xff] }
  0x61   : > { %1855 = vmatmul.msk.bf16.gmra.mxu0 %vm712_vm0, %v1974_v45  ;;  %1871 = vmatmul.msk.bf16.gmra.mxu1 %vm712_vm0, %v1974_v45  ;;  %v1486_v45 = vld [vmem:[%s3015_s6 + $0x38] sm:$0xff] }
  0x67   : > { %469 = vperm.xlu1 %2052, %v423_v46  }
  0x68   : > { %544 = vperm.xlu2 %2053, %v438_v47   ;;  %464 = vperm.xlu0 %2051, %v422_v48   ;;  %v1058_v47 = vld [vmem:[%s3013_s4 + $0x38] sm:$0xff] }
  0x6f   : > { %454 = vperm.xlu1 %2052, %v420_v49  }
  0x70   : > { %459 = vperm.xlu2 %2053, %v421_v50   ;;  %549 = vperm.xlu0 %2051, %v439_v56  }
  0x71   : > { %1856 = vmatmul.msk.bf16.gmra.mxu0 %vm712_vm0, %v1975_v51  ;;  %1872 = vmatmul.msk.bf16.gmra.mxu1 %vm712_vm0, %v1975_v51 }
  0x77   : > { %539 = vperm.xlu1 %2052, %v437_v1   ;;  %v1484_v1 = vld [vmem:[%s3015_s6 + $0x28] sm:$0xff] }
  0x78   : > { %534 = vperm.xlu0 %2051, %v436_v60   ;;  %1139 = vperm.xlu2 %2053, %v1065_v21   ;;  %v1982_v21 = vld [vmem:[%s3010_s1 + $0x58] sm:$0xff] }
  0x7f   : > { %1129 = vperm.xlu1 %2052, %v1063_v6  }
  0x80   : > { %1144 = vperm.xlu0 %2051, %v1066_v5   ;;  %1134 = vperm.xlu2 %2053, %v1064_v30   ;;  %v1481_v5 = vld [vmem:[%s3015_s6 + $0x10] sm:$0xff] }
  0x81   : > { %1857 = vmatmul.msk.bf16.gmra.mxu0 %vm712_vm0, %v1976_v52  ;;  %1873 = vmatmul.msk.bf16.gmra.mxu1 %vm712_vm0, %v1976_v52 }
  0x82   : > { %v2347_v53 = vpop.permute.xlu2 %514 }
  0x87   : > { %1124 = vperm.xlu1 %2052, %v1062_v13  }
  0x88   : > { %1119 = vperm.xlu0 %2051, %v1061_v12   ;;  %1109 = vperm.xlu2 %2053, %v1059_v38   ;;  %v1053_v12 = vld [vmem:[%s3013_s4 + $0x10] sm:$0xff] }
  0x8a   : > { %v2351_v54 = vpop.permute.xlu2 %519 }
  0x8f   : > { %1099 = vperm.xlu1 %2052, %v1057_v20  }
  0x90   : > { %1114 = vperm.xlu0 %2051, %v1060_v19   ;;  %1104 = vperm.xlu2 %2053, %v1058_v47  }
  0x91   : > { %1858 = vmatmul.msk.bf16.gmra.mxu0 %vm712_vm0, %v1977_v55  ;;  %1874 = vmatmul.msk.bf16.gmra.mxu1 %vm712_vm0, %v1977_v55 }
  0x92   : > { %v2361_v57 = vpop.permute.xlu2 %504 }
  0x97   : > { %1094 = vperm.xlu1 %2052, %v1056_v29  }
  0x98   : > { %1089 = vperm.xlu0 %2051, %v1055_v28   ;;  %1079 = vperm.xlu2 %2053, %v1053_v12   ;;  %v1634_v12 = vld [vmem:[#allocation2] sm:$0x1] }
  0x99   : > { %v2363_v58 = vpop.permute.xlu1 %604 }
  0x9a   : > { %v2365_v59 = vpop.permute.xlu0 %524  ;;  %v2373_v62 = vpop.permute.xlu2 %589 }
  0x9f   : > { %1069 = vperm.xlu1 %2052, %v1051_v37   ;;  %v1480_v37 = vld [vmem:[%s3015_s6 + $0x8] sm:$0xff] }
  0xa0   : > { %1084 = vperm.xlu0 %2051, %v1054_v36   ;;  %v1479_v36 = vld [vmem:[%s3015_s6] sm:$0xff] }
  0xa1   : > { %v2375_v63 = vpop.permute.xlu1 %609  ;;  %1859 = vmatmul.msk.bf16.gmra.mxu0 %vm712_vm0, %v1978_v61  ;;  %1875 = vmatmul.msk.bf16.gmra.mxu1 %vm712_vm0, %v1978_v61 }
  0xa2   : > { %v2377_v0 = vpop.permute.xlu0 %529  ;;  %v2386_v3 = vpop.permute.xlu2 %574 }
  0xa7   : > { %1524 = vperm.xlu1 %2052, %v1486_v45  }
  0xa8   : > { %1519 = vperm.xlu0 %2051, %v1485_v44  }
  0xa9   : > { %v2384_v2 = vpop.permute.xlu1 %599 }
  0xaa   : > { %v2388_v4 = vpop.permute.xlu0 %594  ;;  %v2414_v14 = vpop.permute.xlu2 %489 }
  0xae   : > { %v2399_v8 = vpop.f32.mrf.mxu0  ;;  %v2401_v9 = vpop.f32.mrf.mxu1 }
  0xaf   : > { %1499 = vperm.xlu1 %2052, %v1481_v5   ;;  %v1482_v5 = vld [vmem:[%s3015_s6 + $0x18] sm:$0xff] }
  0xb0   : > { %1514 = vperm.xlu0 %2051, %v1484_v1  }
  0xb1   : > { %v2403_v10 = vpop.permute.xlu1 %584  ;;  %1860 = vmatmul.msk.bf16.gmra.mxu0 %vm712_vm0, %v1979_v7  ;;  %1876 = vmatmul.msk.bf16.gmra.mxu1 %vm712_vm0, %v1979_v7 }
  0xb2   : > { %v2405_v11 = vpop.permute.xlu0 %509  ;;  %v2434_v22 = vpop.permute.xlu2 %474 }
  0xb6   : > { %v2417_v15 = vpop.f32.mrf.mxu0  ;;  %v2419_v16 = vpop.f32.mrf.mxu1 }
  0xb7   : > { %1494 = vperm.xlu1 %2052, %v1480_v37  }
  0xb8   : > { %1489 = vperm.xlu0 %2051, %v1479_v36  }
  0xb9   : > { %v2421_v17 = vpop.permute.xlu1 %499 }
  0xba   : > { %v2423_v18 = vpop.permute.xlu0 %494  ;;  %v2456_v32 = vpop.permute.xlu2 %559 }
  0xbe   : > { %v775_v24 = vpop.f32.mrf.mxu0  ;;  %v2439_v25 = vpop.f32.mrf.mxu1 }
  0xc1   : > { %v2441_v26 = vpop.permute.xlu1 %484  ;;  %1861 = vmatmul.msk.bf16.gmra.mxu0 %vm712_vm0, %v1980_v23  ;;  %1877 = vmatmul.msk.bf16.gmra.mxu1 %vm712_vm0, %v1980_v23 }
  0xc2   : > { %v2443_v27 = vpop.permute.xlu0 %579  ;;  %v2489_v46 = vpop.permute.xlu2 %544 }
  0xc6   : > { %v777_v31 = vpop.f32.mrf.mxu0  ;;  %v2458_v33 = vpop.f32.mrf.mxu1 }
  0xc9   : > { %v2460_v34 = vpop.permute.xlu1 %569 }
  0xca   : > { %v2462_v35 = vpop.permute.xlu0 %564  ;;  %v460_v19 = vpop.permute.xlu2 %459 }
  0xcb   : > { %v862_v36 = vadd.f32 %v2419_v16, %v460_v19 }
  0xce   : > { %v780_v40 = vpop.f32.mrf.mxu0  ;;  %v2476_v41 = vpop.f32.mrf.mxu1 }
  0xcf   : > { %v781_v48 = vadd.f32 %v780_v40, %v2434_v22 }
  0xd1   : > { %v2478_v42 = vpop.permute.xlu1 %554  ;;  %1862 = vmatmul.msk.bf16.gmra.mxu0 %vm712_vm0, %v1981_v39  ;;  %1878 = vmatmul.msk.bf16.gmra.mxu1 %vm712_vm0, %v1981_v39  ;;  %v947_v55 = vmax.f32 %v781_v48, 0.0 }
  0xd2   : > { %v2480_v43 = vpop.permute.xlu0 %479 }
  0xd6   : > { %v782_v49 = vpop.f32.mrf.mxu0  ;;  %v2497_v51 = vpop.f32.mrf.mxu1 }
  0xd7   : > { %v783_v50 = vadd.f32 %v782_v49, %v2480_v43 }
  0xd9   : > { %v2499_v52 = vpop.permute.xlu1 %469  ;;  %v949_v56 = vmax.f32 %v783_v50, 0.0  ;;  %v1483_v50 = vld [vmem:[%s3015_s6 + $0x20] sm:$0xff] }
  0xda   : > { %v778_v60 = vadd.f32 %v777_v31, %v2499_v52  ;;  %v2502_v61 = vpop.permute.xlu0 %464 }
  0xdb   : > { %v776_v6 = vadd.f32 %v775_v24, %v2502_v61  ;;  %v2514_v13 = vpack.c.bf16 %v949_v56, %v947_v55  ;;  %v773_v24 = vadd.f32 %v2417_v15, %v460_v19  ;;  %v1983_v56 = vld [vmem:[%s3010_s1 + $0x60] sm:$0xff]  ;;  %v865_v16 = vadd.f32 %v2439_v25, %v2502_v61  ;;  %v1986_v19 = vld [vmem:[%s3010_s1 + $0x78] sm:$0xff] }
  0xdc   : > { %v945_v7 = vmax.f32 %v778_v60, 0.0 }
  0xdd   : > { %v943_v20 = vmax.f32 %v776_v6, 0.0  ;;  %v941_v38 = vmax.f32 %v773_v24, 0.0 }
  0xde   : > { %v785_v23 = vpop.f32.mrf.mxu0  ;;  %v2522_v29 = vpop.f32.mrf.mxu1 }
  0xdf   : > { %v2519_v28 = vpack.c.bf16 %v945_v7, %v943_v20  ;;  %v786_v15 = vadd.f32 %v785_v23, %v2441_v26  ;;  %v1984_v20 = vld [vmem:[%s3010_s1 + $0x68] sm:$0xff] }
  0xe1   : > { %v455_v30 = vpop.permute.xlu1 %454  ;;  %1863 = vmatmul.msk.bf16.gmra.mxu0 %vm712_vm0, %v1982_v21  ;;  %1879 = vmatmul.msk.bf16.gmra.mxu1 %vm712_vm0, %v1982_v21  ;;  %v951_v48 = vmax.f32 %v786_v15, 0.0  ;;  %v942_v15 = vmax.f32 %v862_v36, 0.0 }
  0xe2   : > { %v771_v31 = vadd.f32 %v2399_v8, %v455_v30  ;;  %v1052_v8 = vld [vmem:[%s3013_s4 + $0x8] sm:$0xff]  ;;  %v860_v37 = vadd.f32 %v2401_v9, %v455_v30  ;;  %v867_v9 = vadd.f32 %v2458_v33, %v2499_v52  ;;  %v2597_v61 = vpop.permute.xlu0 %549 }
  0xe3   : > { %1074 = vperm.xlu2 %2053, %v1052_v8  }
  0xe4   : > { %v939_v39 = vmax.f32 %v771_v31, 0.0 }
  0xe6   : > { %v2537_v40 = vpack.c.bf16 %v941_v38, %v939_v39  ;;  %v787_v44 = vpop.f32.mrf.mxu0  ;;  %v2540_v47 = vpop.f32.mrf.mxu1  ;;  %v1985_v38 = vld [vmem:[%s3010_s1 + $0x70] sm:$0xff] }
  0xe7   : > { %v788_v45 = vadd.f32 %v787_v44, %v2414_v14  ;;  %v940_v44 = vmax.f32 %v860_v37, 0.0 }
  0xe9   : > { %v953_v49 = vmax.f32 %v788_v45, 0.0  ;;  %v2579_v45 = vpack.c.bf16 %v942_v15, %v940_v44 }
  0xeb   : > { %v2545_v55 = vpack.c.bf16 %v953_v49, %v951_v48  ;;  %1509 = vperm.xlu2 %2053, %v1483_v50  }
  0xee   : > { %v2550_v60 = vpop.f32.mrf.mxu0  ;;  %v2552_v1 = vpop.f32.mrf.mxu1 }
  0xf1   : > { %1864 = vmatmul.msk.bf16.gmra.mxu0 %vm712_vm0, %v1983_v56  ;;  %1880 = vmatmul.msk.bf16.gmra.mxu1 %vm712_vm0, %v1983_v56  ;;  %v946_v56 = vmax.f32 %v867_v9, 0.0 }
  0xf3   : > { %1504 = vperm.xlu2 %2053, %v1482_v5   ;;  %v944_v5 = vmax.f32 %v865_v16, 0.0 }
  0xf6   : > { %v792_v6 = vpop.f32.mrf.mxu0  ;;  %v2559_v7 = vpop.f32.mrf.mxu1 }
  0xfb   : > { %1637 = vperm.xlu2 %2053, %v1634_v12  }
  0xfe   : > { %v795_v21 = vpop.f32.mrf.mxu0  ;;  %v2564_v23 = vpop.f32.mrf.mxu1 }
 0x101   : > { %1865 = vmatmul.msk.bf16.gmra.mxu0 %vm712_vm0, %v1984_v20  ;;  %1881 = vmatmul.msk.bf16.gmra.mxu1 %vm712_vm0, %v1984_v20  ;;  %v2593_v20 = vpack.c.bf16 %v946_v56, %v944_v5 }
 0x106   : > { %v797_v24 = vpop.f32.mrf.mxu0  ;;  %v2568_v31 = vpop.f32.mrf.mxu1 }
 0x107   : > { %v798_v44 = vadd.f32 %v797_v24, %v2405_v11 }
 0x10e   : > { %v800_v39 = vpop.f32.mrf.mxu0  ;;  %v2575_v8 = vpop.f32.mrf.mxu1 }
 0x10f   : > { %v801_v37 = vadd.f32 %v800_v39, %v2347_v53  ;;  %v961_v39 = vmax.f32 %v798_v44, 0.0 }
 0x111   : > { %1866 = vmatmul.msk.bf16.gmra.mxu0 %vm712_vm0, %v1985_v38  ;;  %1882 = vmatmul.msk.bf16.gmra.mxu1 %vm712_vm0, %v1985_v38  ;;  %v963_v56 = vmax.f32 %v801_v37, 0.0 }
 0x116   : > { %v802_v48 = vpop.f32.mrf.mxu0  ;;  %v2581_v49 = vpop.f32.mrf.mxu1 }
 0x117   : > { %v803_v52 = vadd.f32 %v802_v48, %v2351_v54  ;;  %v796_v48 = vadd.f32 %v795_v21, %v2361_v57 }
 0x119   : > { %v965_v9 = vmax.f32 %v803_v52, 0.0 }
 0x11e   : > { %v805_v30 = vpop.f32.mrf.mxu0  ;;  %v894_v50 = vpop.f32.mrf.mxu1 }
 0x11f   : > { %v806_v12 = vadd.f32 %v805_v30, %v2365_v59  ;;  %v872_v30 = vadd.f32 %v2497_v51, %v2480_v43  ;;  %v877_v43 = vadd.f32 %v2540_v47, %v2414_v14  ;;  %v535_v51 = vpop.permute.xlu0 %534  ;;  %v895_v47 = vadd.f32 %v894_v50, %v2365_v59  ;;  %v1886_v59 = vld [vmem:[%s3012_s3] sm:$0xf] }
 0x121   : > { %1867 = vmatmul.msk.bf16.gmra.mxu0 %vm712_vm0, %v1986_v19  ;;  %1883 = vmatmul.msk.bf16.gmra.mxu1 %vm712_vm0, %v1986_v19  ;;  %v967_v38 = vmax.f32 %v806_v12, 0.0  ;;  %v870_v19 = vadd.f32 %v2476_v41, %v2434_v22  ;;  %v1031_v12 = vpack.c.bf16 %v965_v9, %v963_v56  ;;  %v950_v52 = vmax.f32 %v872_v30, 0.0 }
 0x122   : > { %v959_v22 = vmax.f32 %v796_v48, 0.0  ;;  %v875_v41 = vadd.f32 %v2522_v29, %v2441_v26 }
 0x123   : > { %v948_v24 = vmax.f32 %v870_v19, 0.0  ;;  %v540_v19 = vpop.permute.xlu1 %539 }
 0x124   : > { %v952_v9 = vmax.f32 %v875_v41, 0.0  ;;  %v885_v41 = vadd.f32 %v2564_v23, %v2361_v57 }
 0x125   : > { %v2615_v44 = vpack.c.bf16 %v950_v52, %v948_v24  ;;  %v890_v24 = vadd.f32 %v2575_v8, %v2347_v53  ;;  %v892_v52 = vadd.f32 %v2581_v49, %v2351_v54  ;;  %v1992_v53 = vld [vmem:[%s3012_s3 + $0x4] sm:$0xf0]  ;;  %v887_v54 = vadd.f32 %v2568_v31, %v2405_v11 }
 0x126   : > { %v807_v33 = vpop.f32.mrf.mxu0  ;;  %v896_v36 = vpop.f32.mrf.mxu1  ;;  %v2642_v50 = vor.u32 %v1992_v53, %v1886_v59  ;;  %v960_v11 = vmax.f32 %v885_v41, 0.0 }
 0x127   : > { %v808_v25 = vadd.f32 %v807_v33, %v2377_v0  ;;  %v793_v33 = vadd.f32 %v792_v6, %v2421_v17  ;;  %v1029_v6 = vpack.c.bf16 %v961_v39, %v959_v22  ;;  %v962_v31 = vmax.f32 %v887_v54, 0.0 }
 0x129   : > { %v969_v15 = vmax.f32 %v808_v25, 0.0  ;;  %v957_v21 = vmax.f32 %v793_v33, 0.0 }
 0x12b   : > { %v1033_v16 = vpack.c.bf16 %v969_v15, %v967_v38  ;;  %v791_v38 = vadd.f32 %v2550_v60, %v2423_v18 }
 0x12d   : > { %1227 = vmatpush.bf16.msra.mxu2 %v1033_v16  ;;  %v955_v37 = vmax.f32 %v791_v38, 0.0  ;;  %v954_v16 = vmax.f32 %v877_v43, 0.0  ;;  %v968_v38 = vmax.f32 %v895_v47, 0.0 }
 0x12e   : > { %v810_v5 = vpop.f32.mrf.mxu0  ;;  %v2607_v25 = vpop.f32.mrf.mxu1 }
 0x12f   : > { %v811_v15 = vadd.f32 %v810_v5, %v535_v51  ;;  %v1027_v48 = vpack.c.bf16 %v957_v21, %v955_v37  ;;  %v2617_v29 = vpack.c.bf16 %v954_v16, %v952_v9  ;;  %v897_v5 = vadd.f32 %v896_v36, %v2377_v0 }
 0x130   : > { %v964_v0 = vmax.f32 %v890_v24, 0.0  ;;  %v882_v21 = vadd.f32 %v2559_v7, %v2421_v17 }
 0x131   : > { %1228 = vmatpush.bf16.msra.mxu2 %v1031_v12  ;;  %v971_v12 = vmax.f32 %v811_v15, 0.0  ;;  %v970_v22 = vmax.f32 %v897_v5, 0.0 }
 0x132   : > { %v958_v9 = vmax.f32 %v882_v21, 0.0 }
 0x133   : > { %v1034_v49 = vpack.c.bf16 %v970_v22, %v968_v38 }
 0x135   : > { %1229 = vmatpush.bf16.msra.mxu2 %v1029_v6 }
 0x136   : > { %v812_v60 = vpop.f32.mrf.mxu0  ;;  %v901_v56 = vpop.f32.mrf.mxu1 }
 0x137   : > { %v813_v30 = vadd.f32 %v812_v60, %v540_v19  ;;  %v902_v60 = vadd.f32 %v901_v56, %v540_v19 }
 0x139   : > { %v973_v26 = vmax.f32 %v813_v30, 0.0  ;;  %1230 = vmatpush.bf16.msra.mxu2 %v1027_v48 }
 0x13b   : > { %v2619_v14 = vpack.c.bf16 %v973_v26, %v971_v12  ;;  %v974_v12 = vmax.f32 %v902_v60, 0.0 }
 0x13d   : > { %1231 = vmatpush.bf16.msra.mxu2 %v2545_v55 }
 0x13e   : > { %v815_v33 = vpop.f32.mrf.mxu0  ;;  %v904_v39 = vpop.f32.mrf.mxu1 }
 0x13f   : > { %v816_v55 = vadd.f32 %v815_v33, %v2489_v46  ;;  %v905_v30 = vadd.f32 %v904_v39, %v2489_v46  ;;  %v1994_v46 = vld [vmem:[%s3012_s3 + $0x14] sm:$0xf0] }
 0x141   : > { %1232 = vmatpush.bf16.msra.mxu2 %v2514_v13  ;;  %v966_v13 = vmax.f32 %v892_v52, 0.0  ;;  %v975_v36 = vmax.f32 %v816_v55, 0.0  ;;  %v976_v5 = vmax.f32 %v905_v30, 0.0 }
 0x143   : > { %v1032_v6 = vpack.c.bf16 %v966_v13, %v964_v0  ;;  %v1996_v13 = vld [vmem:[%s3012_s3 + $0x24] sm:$0xf0] }
 0x145   : > { %1233 = vmatpush.bf16.msra.mxu2 %v2519_v28  ;;  %v880_v28 = vadd.f32 %v2552_v1, %v2423_v18  ;;  %v1030_v18 = vpack.c.bf16 %v962_v31, %v960_v11  ;;  %v900_v1 = vadd.f32 %v2607_v25, %v535_v51  ;;  %v1894_v25 = vld [vmem:[%s3012_s3 + $0x10] sm:$0xf]  ;;  %v1998_v31 = vld [vmem:[%s3012_s3 + $0x34] sm:$0xf0] }
 0x146   : > { %v817_v8 = vpop.f32.mrf.mxu0  ;;  %v906_v23 = vpop.f32.mrf.mxu1  ;;  %v2664_v24 = vor.u32 %v1994_v46, %v1894_v25  ;;  %v1934_v46 = vld [vmem:[%s3012_s3 + $0x60] sm:$0xf] }
 0x147   : > { %v818_v57 = vadd.f32 %v817_v8, %v2597_v61  ;;  %v956_v15 = vmax.f32 %v880_v28, 0.0  ;;  %v907_v17 = vadd.f32 %v906_v23, %v2597_v61  ;;  %v972_v48 = vmax.f32 %v900_v1, 0.0  ;;  %v2000_v1 = vld [vmem:[%s3012_s3 + $0x44] sm:$0xf0] }
 0x149   : > { %v977_v43 = vmax.f32 %v818_v57, 0.0  ;;  %1234 = vmatpush.bf16.msra.mxu2 %v2537_v40  ;;  %v1028_v7 = vpack.c.bf16 %v958_v9, %v956_v15  ;;  %v978_v33 = vmax.f32 %v907_v17, 0.0  ;;  %v2669_v22 = vpack.c.bf16 %v974_v12, %v972_v48  ;;  %v1926_v48 = vld [vmem:[%s3012_s3 + $0x50] sm:$0xf]  ;;  %v2002_v12 = vld [vmem:[%s3012_s3 + $0x54] sm:$0xf0] }
 0x14b   : > { %v2649_v37 = vpack.c.bf16 %v977_v43, %v975_v36  ;;  %v2667_v38 = vpack.c.bf16 %v978_v33, %v976_v5 }
 0x14c   : > { %1235 = vmatmul.bf16.vlgmr.msra.gmra.mxu2 %v2642_v50 }
 0x14d   : > { %1325 = vmatpush.bf16.msrb.mxu2 %v1034_v49 }
 0x14e   : > { %v820_v16 = vpop.f32.mrf.mxu0  ;;  %v909_v40 = vpop.f32.mrf.mxu1 }
 0x14f   : > { %v821_v26 = vadd.f32 %v820_v16, %v2478_v42  ;;  %v910_v47 = vadd.f32 %v909_v40, %v2478_v42 }
 0x151   : > { %1326 = vmatpush.bf16.msrb.mxu2 %v1032_v6  ;;  %v979_v19 = vmax.f32 %v821_v26, 0.0  ;;  %v980_v56 = vmax.f32 %v910_v47, 0.0  ;;  %v2725_v47 = vor.u32 %v2002_v12, %v1926_v48  ;;  %v1991_v12 = vld [vmem:[%s3012_s3 + $0x4] sm:$0xf] }
 0x155   : > { %1327 = vmatpush.bf16.msrb.mxu2 %v1030_v18  ;;  %v1918_v18 = vld [vmem:[%s3012_s3 + $0x40] sm:$0xf] }
 0x156   : > { %v822_v51 = vpop.f32.mrf.mxu0  ;;  %v911_v39 = vpop.f32.mrf.mxu1  ;;  %v2714_v40 = vor.u32 %v2000_v1, %v1918_v18 }
 0x157   : > { %v823_v61 = vadd.f32 %v822_v51, %v2456_v32  ;;  %v912_v52 = vadd.f32 %v911_v39, %v2456_v32  ;;  %v2004_v51 = vld [vmem:[%s3012_s3 + $0x64] sm:$0xf0] }
 0x158   : > { %v2737_v39 = vor.u32 %v2004_v51, %v1934_v46 }
 0x159   : > { %1328 = vmatpush.bf16.msrb.mxu2 %v1028_v7  ;;  %v981_v42 = vmax.f32 %v823_v61, 0.0  ;;  %v982_v41 = vmax.f32 %v912_v52, 0.0 }
 0x15b   : > { %v2672_v55 = vpack.c.bf16 %v981_v42, %v979_v19  ;;  %v2675_v59 = vpack.c.bf16 %v982_v41, %v980_v56 }
 0x15c   : > { %1240 = vmatmul.bf16.gmra.mxu2 %v2664_v24 }
 0x15d   : > { %1329 = vmatpush.bf16.msrb.mxu2 %v2617_v29  ;;  %v1902_v29 = vld [vmem:[%s3012_s3 + $0x20] sm:$0xf] }
 0x15e   : > { %v825_v53 = vpop.f32.mrf.mxu0  ;;  %v914_v54 = vpop.f32.mrf.mxu1  ;;  %v2689_v57 = vor.u32 %v1996_v13, %v1902_v29 }
 0x15f   : > { %v826_v32 = vadd.f32 %v825_v53, %v2462_v35  ;;  %v915_v0 = vadd.f32 %v914_v54, %v2462_v35 }
 0x161   : > { %1330 = vmatpush.bf16.msrb.mxu2 %v2615_v44  ;;  %v984_v23 = vmax.f32 %v915_v0, 0.0 }
 0x165   : > { %1331 = vmatpush.bf16.msrb.mxu2 %v2593_v20  ;;  %v983_v20 = vmax.f32 %v826_v32, 0.0 }
 0x166   : > { %v827_v8 = vpop.f32.mrf.mxu0  ;;  %v916_v49 = vpop.f32.mrf.mxu1 }
 0x167   : > { %v828_v44 = vadd.f32 %v827_v8, %v2460_v34  ;;  %v917_v35 = vadd.f32 %v916_v49, %v2460_v34 }
 0x169   : > { %1332 = vmatpush.bf16.msrb.mxu2 %v2579_v45  ;;  %v985_v28 = vmax.f32 %v828_v44, 0.0  ;;  %v986_v36 = vmax.f32 %v917_v35, 0.0  ;;  %v1910_v45 = vld [vmem:[%s3012_s3 + $0x30] sm:$0xf] }
 0x16a   : > { %v2703_v9 = vor.u32 %v1998_v31, %v1910_v45  ;;  %v1942_v31 = vld [vmem:[%s3012_s3 + $0x70] sm:$0xf] }
 0x16b   : > { %v1041_v43 = vpack.c.bf16 %v985_v28, %v983_v20  ;;  %v2693_v21 = vpack.c.bf16 %v986_v36, %v984_v23 }
 0x16c   : > { %1245 = vmatmul.bf16.gmra.mxu2 %v2689_v57 }
 0x16e   : > { %v830_v11 = vpop.f32.mrf.mxu0  ;;  %v2701_v15 = vpop.f32.mrf.mxu1 }
 0x16f   : > { %v831_v20 = vadd.f32 %v830_v11, %v2386_v3  ;;  %v920_v46 = vadd.f32 %v2701_v15, %v2386_v3  ;;  %v1993_v3 = vld [vmem:[%s3012_s3 + $0x14] sm:$0xf] }
 0x171   : > { %v987_v45 = vmax.f32 %v831_v20, 0.0  ;;  %v2005_v20 = vld [vmem:[%s3012_s3 + $0x74] sm:$0xf] }
 0x176   : > { %v832_v6 = vpop.f32.mrf.mxu0  ;;  %v2706_v16 = vpop.f32.mrf.mxu1 }
 0x177   : > { %v833_v8 = vadd.f32 %v832_v6, %v2443_v27 }
 0x179   : > { %v989_v28 = vmax.f32 %v833_v8, 0.0 }
 0x17b   : > { %v1043_v6 = vpack.c.bf16 %v989_v28, %v987_v45  ;;  %v2864_v45 = vpop.permute.xlu0 %1144 }
 0x17c   : > { %1250 = vmatmul.bf16.gmra.mxu2 %v2703_v9 }
 0x17e   : > { %v835_v34 = vpop.f32.mrf.mxu0  ;;  %v2716_v30 = vpop.f32.mrf.mxu1 }
 0x17f   : > { %v836_v29 = vadd.f32 %v835_v34, %v2403_v10  ;;  %v2006_v34 = vld [vmem:[%s3012_s3 + $0x74] sm:$0xf0] }
 0x180   : > { %v2751_v18 = vor.u32 %v2006_v34, %v1942_v31 }
 0x181   : > { %v991_v23 = vmax.f32 %v836_v29, 0.0  ;;  %v1936_v29 = vld [vmem:[%s3012_s3 + $0x68] sm:$0xf0] }
 0x186   : > { %v837_v60 = vpop.f32.mrf.mxu0  ;;  %v926_v7 = vpop.f32.mrf.mxu1 }
 0x187   : > { %v838_v54 = vadd.f32 %v837_v60, %v2373_v62 }
 0x189   : > { %v993_v44 = vmax.f32 %v838_v54, 0.0 }
 0x18b   : > { %v1045_v36 = vpack.c.bf16 %v993_v44, %v991_v23  ;;  %v1944_v23 = vld [vmem:[%s3012_s3 + $0x78] sm:$0xf0] }
 0x18c   : > { %1255 = vmatmul.bf16.gmra.mxu2 %v2714_v40 }
 0x18e   : > { %v840_v17 = vpop.f32.mrf.mxu0  ;;  %v929_v33 = vpop.f32.mrf.mxu1 }
 0x18f   : > { %v841_v42 = vadd.f32 %v840_v17, %v2388_v4 }
 0x191   : > { %v995_v13 = vmax.f32 %v841_v42, 0.0 }
 0x196   : > { %v842_v26 = vpop.f32.mrf.mxu0  ;;  %v931_v52 = vpop.f32.mrf.mxu1 }
 0x197   : > { %v843_v19 = vadd.f32 %v842_v26, %v2384_v2  ;;  %v932_v17 = vadd.f32 %v931_v52, %v2384_v2  ;;  %v1888_v26 = vld [vmem:[%s3012_s3 + $0x8] sm:$0xf0]  ;;  %v925_v2 = vadd.f32 %v2716_v30, %v2403_v10 }
 0x199   : > { %v997_v32 = vmax.f32 %v843_v19, 0.0  ;;  %v1920_v19 = vld [vmem:[%s3012_s3 + $0x48] sm:$0xf0] }
 0x19b   : > { %v1047_v49 = vpack.c.bf16 %v997_v32, %v995_v13  ;;  %v2832_v32 = vpop.permute.xlu2 %1139 }
 0x19c   : > { %1260 = vmatmul.bf16.gmra.mxu2 %v2725_v47 }
 0x19e   : > { %v845_v5 = vpop.f32.mrf.mxu0  ;;  %v934_v35 = vpop.f32.mrf.mxu1 }
 0x19f   : > { %v846_v25 = vadd.f32 %v845_v5, %v2363_v58  ;;  %v935_v60 = vadd.f32 %v934_v35, %v2363_v58  ;;  %v998_v5 = vmax.f32 %v932_v17, 0.0  ;;  %v2858_v35 = vor.u32 %v2005_v20, %v1944_v23 }
 0x1a1   : > { %v999_v41 = vmax.f32 %v846_v25, 0.0  ;;  %v2767_v25 = vor.u32 %v1991_v12, %v1888_v26 }
 0x1a6   : > { %v847_v61 = vpop.f32.mrf.mxu0  ;;  %v936_v11 = vpop.f32.mrf.mxu1 }
 0x1a7   : > { %v848_v56 = vadd.f32 %v847_v61, %v2375_v63  ;;  %v937_v1 = vadd.f32 %v936_v11, %v2375_v63  ;;  %v1000_v63 = vmax.f32 %v935_v60, 0.0 }
 0x1a9   : > { %v1001_v53 = vmax.f32 %v848_v56, 0.0  ;;  %v1002_v48 = vmax.f32 %v937_v1, 0.0 }
 0x1ab   : > { %v1049_v0 = vpack.c.bf16 %v1001_v53, %v999_v41  ;;  %v1050_v58 = vpack.c.bf16 %v1002_v48, %v1000_v63  ;;  %v1928_v41 = vld [vmem:[%s3012_s3 + $0x58] sm:$0xf0] }
 0x1ac   : > { %1265 = vmatmul.bf16.gmra.mxu2 %v2737_v39 }
 0x1ad   : > { %1276 = vmatpush.bf16.msra.mxu3 %v1049_v0  ;;  %v2834_v0 = vpop.permute.xlu1 %1129 }
 0x1b1   : > { %1277 = vmatpush.bf16.msra.mxu3 %v1047_v49 }
 0x1b5   : > { %1278 = vmatpush.bf16.msra.mxu3 %v1045_v36  ;;  %v2848_v44 = vpop.permute.xlu1 %1124 }
 0x1b9   : > { %1279 = vmatpush.bf16.msra.mxu3 %v1043_v6  ;;  %v2870_v6 = vpop.permute.xlu0 %1119 }
 0x1bc   : > { %1270 = vmatmul.bf16.gmra.mxu2 %v2751_v18 }
 0x1bd   : > { %1280 = vmatpush.bf16.msra.mxu3 %v1041_v43  ;;  %v930_v43 = vadd.f32 %v929_v33, %v2388_v4  ;;  %v922_v4 = vadd.f32 %v2706_v16, %v2443_v27  ;;  %v1896_v27 = vld [vmem:[%s3012_s3 + $0x18] sm:$0xf0]  ;;  %v1904_v16 = vld [vmem:[%s3012_s3 + $0x28] sm:$0xf0]  ;;  %v2860_v36 = vpop.permute.xlu1 %1099 }
 0x1be   : > { %v2784_v15 = vor.u32 %v1993_v3, %v1896_v27 }
 0x1bf   : > { %v990_v51 = vmax.f32 %v922_v4, 0.0 }
 0x1c1   : > { %1281 = vmatpush.bf16.msra.mxu3 %v2672_v55  ;;  %v927_v55 = vadd.f32 %v926_v7, %v2373_v62  ;;  %v992_v7 = vmax.f32 %v925_v2, 0.0  ;;  %v2878_v12 = vpop.permute.xlu0 %1114 }
 0x1c3   : > { %v994_v33 = vmax.f32 %v927_v55, 0.0 }
 0x1c5   : > { %1282 = vmatpush.bf16.msra.mxu3 %v2649_v37  ;;  %v996_v37 = vmax.f32 %v930_v43, 0.0  ;;  %v1046_v61 = vpack.c.bf16 %v994_v33, %v992_v7  ;;  %v2868_v34 = vpop.permute.xlu1 %1094 }
 0x1c7   : > { %v1048_v62 = vpack.c.bf16 %v998_v5, %v996_v37 }
 0x1c9   : > { %1283 = vmatpush.bf16.msra.mxu3 %v2619_v14  ;;  %v988_v14 = vmax.f32 %v920_v46, 0.0 }
 0x1cb   : > { %v1044_v10 = vpack.c.bf16 %v990_v51, %v988_v14 }
 0x1cc   : > { %1284 = vmatmul.bf16.vlgmr.msra.gmra.mxu3 %v2767_v25  ;;  %1333 = vmatmul.bf16.vlgmr.msrb.gmra.mxu2 %v2642_v50  ;;  %v1995_v50 = vld [vmem:[%s3012_s3 + $0x24] sm:$0xf] }
 0x1cd   : > { %1374 = vmatpush.bf16.msrb.mxu3 %v1050_v58  ;;  %v2798_v30 = vor.u32 %v1995_v50, %v1904_v16  ;;  %v2875_v1 = vpop.permute.xlu1 %1069  ;;  %v2883_v58 = vpop.permute.xlu0 %1089 }
 0x1d1   : > { %1375 = vmatpush.bf16.msrb.mxu3 %v1048_v62 }
 0x1d5   : > { %1376 = vmatpush.bf16.msrb.mxu3 %v1046_v61  ;;  %v2889_v33 = vpop.permute.xlu0 %1084 }
 0x1d9   : > { %1377 = vmatpush.bf16.msrb.mxu3 %v1044_v10 }
 0x1dc   : > { %1289 = vmatmul.bf16.gmra.mxu3 %v2784_v15  ;;  %1338 = vmatmul.bf16.gmra.mxu2 %v2664_v24  ;;  %v1997_v24 = vld [vmem:[%s3012_s3 + $0x34] sm:$0xf] }
 0x1dd   : > { %1378 = vmatpush.bf16.msrb.mxu3 %v2693_v21 }
 0x1e1   : > { %1379 = vmatpush.bf16.msrb.mxu3 %v2675_v59  ;;  %v1236_v59 = vpop.f32.mrf.mxu2 }
 0x1e2   : > { %v1237_v60 = vadd.f32 %v1236_v59, %v2875_v1 }
 0x1e5   : > { %1380 = vmatpush.bf16.msrb.mxu3 %v2667_v38  ;;  %v1912_v38 = vld [vmem:[%s3012_s3 + $0x38] sm:$0xf0] }
 0x1e6   : > { %v2808_v21 = vor.u32 %v1997_v24, %v1912_v38 }
 0x1e9   : > { %1381 = vmatpush.bf16.msrb.mxu3 %v2669_v22  ;;  %v1238_v22 = vpop.f32.mrf.mxu2 }
 0x1ec   : > { %1294 = vmatmul.bf16.gmra.mxu3 %v2798_v30  ;;  %1343 = vmatmul.bf16.gmra.mxu2 %v2689_v57  ;;  %v1999_v57 = vld [vmem:[%s3012_s3 + $0x44] sm:$0xf] }
 0x1ed   : > { %v2818_v56 = vor.u32 %v1999_v57, %v1920_v19 }
 0x1f1   : > { %v1241_v42 = vpop.f32.mrf.mxu2 }
 0x1f9   : > { %v1243_v52 = vpop.f32.mrf.mxu2 }
 0x1fa   : > { %v1244_v62 = vadd.f32 %v1243_v52, %v2889_v33 }
 0x1fc   : > { %1299 = vmatmul.bf16.gmra.mxu3 %v2808_v21  ;;  %1348 = vmatmul.bf16.gmra.mxu2 %v2703_v9  ;;  %v2001_v9 = vld [vmem:[%s3012_s3 + $0x54] sm:$0xf] }
 0x1fd   : > { %v2828_v53 = vor.u32 %v2001_v9, %v1928_v41 }
 0x201   : > { %v1246_v54 = vpop.f32.mrf.mxu2 }
 0x202   : > { %v1247_v27 = vadd.f32 %v1246_v54, %v2883_v58 }
 0x209   : > { %v1248_v13 = vpop.f32.mrf.mxu2 }
 0x20a   : > { %v1249_v24 = vadd.f32 %v1248_v13, %v2868_v34 }
 0x20c   : > { %1304 = vmatmul.bf16.gmra.mxu3 %v2818_v56  ;;  %1353 = vmatmul.bf16.gmra.mxu2 %v2714_v40  ;;  %v2003_v40 = vld [vmem:[%s3012_s3 + $0x64] sm:$0xf] }
 0x20d   : > { %v2842_v8 = vor.u32 %v2003_v40, %v1936_v29 }
 0x211   : > { %v1251_v49 = vpop.f32.mrf.mxu2 }
 0x21c   : > { %1309 = vmatmul.bf16.gmra.mxu3 %v2828_v53  ;;  %1358 = vmatmul.bf16.gmra.mxu2 %v2725_v47  ;;  %v2846_v47 = vpop.permute.xlu2 %1134 }
 0x224   : > { %v2856_v28 = vpop.permute.xlu2 %1109 }
 0x22c   : > { %1314 = vmatmul.bf16.gmra.mxu3 %v2842_v8  ;;  %1363 = vmatmul.bf16.gmra.mxu2 %v2737_v39  ;;  %v1253_v39 = vpop.f32.mrf.mxu2  ;;  %v2866_v31 = vpop.permute.xlu2 %1104 }
 0x22d   : > { %v1254_v54 = vadd.f32 %v1253_v39, %v2866_v31 }
 0x234   : > { %v2872_v11 = vpop.permute.xlu2 %1079  ;;  %v1256_v2 = vpop.f32.mrf.mxu2 }
 0x235   : > { %v1242_v37 = vadd.f32 %v1241_v42, %v2872_v11 }
 0x23c   : > { %1319 = vmatmul.bf16.gmra.mxu3 %v2858_v35  ;;  %1368 = vmatmul.bf16.gmra.mxu2 %v2751_v18  ;;  %v2880_v18 = vpop.permute.xlu2 %1074  ;;  %v2892_v7 = vpop.f32.mrf.mxu2 }
 0x23d   : > { %v1239_v26 = vadd.f32 %v1238_v22, %v2880_v18 }
 0x244   : > { %v1261_v16 = vpop.f32.mrf.mxu2 }
 0x24c   : > { %1382 = vmatmul.bf16.vlgmr.msrb.gmra.mxu3 %v2767_v25  ;;  %v1263_v19 = vpop.f32.mrf.mxu2 }
 0x24f   : > { %v1285_v17 = vpop.f32.mrf.mxu3 }
 0x250   : > { %v1286_v48 = vadd.f32 %v1285_v17, %v1237_v60  ;;  %v1257_v60 = vadd.f32 %v1256_v2, %v2856_v28 }
 0x252   : > { %v1423_v55 = vmax.f32 %v1286_v48, 0.0 }
 0x254   : > { %v1266_v41 = vpop.f32.mrf.mxu2 }
 0x257   : > { %v1287_v43 = vpop.f32.mrf.mxu3 }
 0x258   : > { %v1288_v63 = vadd.f32 %v1287_v43, %v1239_v26 }
 0x25a   : > { %v1425_v5 = vmax.f32 %v1288_v63, 0.0 }
 0x25c   : > { %1387 = vmatmul.bf16.gmra.mxu3 %v2784_v15  ;;  %v2886_v25 = vpack.c.bf16 %v1425_v5, %v1423_v55  ;;  %v1268_v17 = vpop.f32.mrf.mxu2 }
 0x25f   : > { %v1290_v46 = vpop.f32.mrf.mxu3 }
 0x260   : > { %v1291_v4 = vadd.f32 %v1290_v46, %v1242_v37 }
 0x262   : > { %v1427_v61 = vmax.f32 %v1291_v4, 0.0 }
 0x264   : > { %v1271_v43 = vpop.f32.mrf.mxu2 }
 0x265   : > { %v1272_v4 = vadd.f32 %v1271_v43, %v2832_v32 }
 0x267   : > { %v1292_v14 = vpop.f32.mrf.mxu3 }
 0x268   : > { %v1293_v51 = vadd.f32 %v1292_v14, %v1244_v62  ;;  %v1269_v62 = vadd.f32 %v1268_v17, %v2846_v47 }
 0x26a   : > { %v1429_v10 = vmax.f32 %v1293_v51, 0.0 }
 0x26c   : > { %1392 = vmatmul.bf16.gmra.mxu3 %v2798_v30  ;;  %v2895_v3 = vpack.c.bf16 %v1429_v10, %v1427_v61  ;;  %v1252_v30 = vadd.f32 %v1251_v49, %v2860_v36  ;;  %v1273_v63 = vpop.f32.mrf.mxu2  ;;  %v1267_v61 = vadd.f32 %v1266_v41, %v2834_v0 }
 0x26d   : > { %v1274_v14 = vadd.f32 %v1273_v63, %v2864_v45 }
 0x26f   : > { %v1295_v15 = vpop.f32.mrf.mxu3 }
 0x270   : > { %v1296_v50 = vadd.f32 %v1295_v15, %v1247_v27  ;;  %v1264_v27 = vadd.f32 %v1263_v19, %v2848_v44 }
 0x272   : > { %v1431_v22 = vmax.f32 %v1296_v50, 0.0 }
 0x274   : > { %v1334_v39 = vpop.f32.mrf.mxu2 }
 0x277   : > { %v1297_v38 = vpop.f32.mrf.mxu3 }
 0x278   : > { %v1298_v59 = vadd.f32 %v1297_v38, %v1249_v24  ;;  %v1262_v38 = vadd.f32 %v1261_v16, %v2870_v6 }
 0x27a   : > { %v1433_v57 = vmax.f32 %v1298_v59, 0.0 }
 0x27c   : > { %1397 = vmatmul.bf16.gmra.mxu3 %v2808_v21  ;;  %v2900_v42 = vpack.c.bf16 %v1433_v57, %v1431_v22  ;;  %v1336_v37 = vpop.f32.mrf.mxu2 }
 0x27f   : > { %v1300_v52 = vpop.f32.mrf.mxu3 }
 0x280   : > { %v1301_v9 = vadd.f32 %v1300_v52, %v1252_v30  ;;  %v1259_v30 = vadd.f32 %v2892_v7, %v2878_v12  ;;  %v1335_v52 = vadd.f32 %v1334_v39, %v2875_v1 }
 0x282   : > { %v1435_v20 = vmax.f32 %v1301_v9, 0.0 }
 0x284   : > { %v1339_v2 = vpop.f32.mrf.mxu2 }
 0x287   : > { %v1302_v40 = vpop.f32.mrf.mxu3 }
 0x288   : > { %v1303_v29 = vadd.f32 %v1302_v40, %v1254_v54 }
 0x28a   : > { %v1437_v13 = vmax.f32 %v1303_v29, 0.0 }
 0x28c   : > { %1402 = vmatmul.bf16.gmra.mxu3 %v2818_v56  ;;  %v1469_v23 = vpack.c.bf16 %v1437_v13, %v1435_v20 }
 0x28f   : > { %v1305_v21 = vpop.f32.mrf.mxu3 }
 0x290   : > { %v1306_v48 = vadd.f32 %v1305_v21, %v1257_v60  ;;  %v1337_v21 = vadd.f32 %v1336_v37, %v2880_v18 }
 0x292   : > { %v1439_v43 = vmax.f32 %v1306_v48, 0.0 }
 0x297   : > { %v1307_v26 = vpop.f32.mrf.mxu3 }
 0x298   : > { %v1308_v40 = vadd.f32 %v1307_v26, %v1259_v30  ;;  %v1340_v26 = vadd.f32 %v1339_v2, %v2872_v11 }
 0x29a   : > { %v1441_v60 = vmax.f32 %v1308_v40, 0.0 }
 0x29c   : > { %1407 = vmatmul.bf16.gmra.mxu3 %v2828_v53  ;;  %v1471_v1 = vpack.c.bf16 %v1441_v60, %v1439_v43 }
 0x29f   : > { %v1310_v49 = vpop.f32.mrf.mxu3 }
 0x2a0   : > { %v1311_v9 = vadd.f32 %v1310_v49, %v1262_v38 }
 0x2a2   : > { %v1443_v13 = vmax.f32 %v1311_v9, 0.0 }
 0x2a7   : > { %v1312_v55 = vpop.f32.mrf.mxu3 }
 0x2a8   : > { %v1313_v59 = vadd.f32 %v1312_v55, %v1264_v27 }
 0x2aa   : > { %v1445_v19 = vmax.f32 %v1313_v59, 0.0 }
 0x2ac   : > { %1412 = vmatmul.bf16.gmra.mxu3 %v2842_v8  ;;  %v1473_v16 = vpack.c.bf16 %v1445_v19, %v1443_v13 }
 0x2af   : > { %v1315_v5 = vpop.f32.mrf.mxu3 }
 0x2b0   : > { %v1316_v15 = vadd.f32 %v1315_v5, %v1267_v61 }
 0x2b2   : > { %v1447_v41 = vmax.f32 %v1316_v15, 0.0 }
 0x2b7   : > { %v1317_v46 = vpop.f32.mrf.mxu3 }
 0x2b8   : > { %v1318_v10 = vadd.f32 %v1317_v46, %v1269_v62  ;;  %v2928_v62 = vld [vmem:[%s3014_s5] sm:$0xff] }
 0x2ba   : > { %v1449_v22 = vmax.f32 %v1318_v10, 0.0  ;;  %v2939_v10 = vld [vmem:[%s3014_s5 + $0x8] sm:$0xff] }
 0x2bc   : > { %1417 = vmatmul.bf16.gmra.mxu3 %v2858_v35  ;;  %v1341_v35 = vpop.f32.mrf.mxu2  ;;  %v1475_v20 = vpack.c.bf16 %v1449_v22, %v1447_v41  ;;  %v2949_v22 = vld [vmem:[%s3014_s5 + $0x10] sm:$0xff] }
 0x2bd   : > { %v1342_v18 = vadd.f32 %v1341_v35, %v2889_v33 }
 0x2bf   : > { %v1320_v56 = vpop.f32.mrf.mxu3 }
 0x2c0   : > { %v1321_v53 = vadd.f32 %v1320_v56, %v1272_v4 }
 0x2c2   : > { %v1451_v50 = vmax.f32 %v1321_v53, 0.0 }
 0x2c4   : > { %v1344_v17 = vpop.f32.mrf.mxu2 }
 0x2c5   : > { %v1345_v33 = vadd.f32 %v1344_v17, %v2883_v58 }
 0x2c7   : > { %v1322_v51 = vpop.f32.mrf.mxu3 }
 0x2c8   : > { %v1323_v8 = vadd.f32 %v1322_v51, %v1274_v14 }
 0x2ca   : > { %v1453_v24 = vmax.f32 %v1323_v8, 0.0 }
 0x2cc   : > { %v1477_v57 = vpack.c.bf16 %v1453_v24, %v1451_v50  ;;  %v1346_v5 = vpop.f32.mrf.mxu2 }
 0x2cd   : > { %v1347_v53 = vadd.f32 %v1346_v5, %v2868_v34 }
 0x2ce   : > { %1551 = vmatpush.bf16.msrb.mxu0 %v1477_v57 }
 0x2cf   : > { %v1383_v54 = vpop.f32.mrf.mxu3 }
 0x2d0   : > { %v1384_v29 = vadd.f32 %v1383_v54, %v1335_v52 }
 0x2d2   : > { %1552 = vmatpush.bf16.msrb.mxu0 %v1475_v20  ;;  %v1424_v49 = vmax.f32 %v1384_v29, 0.0 }
 0x2d4   : > { %v1349_v4 = vpop.f32.mrf.mxu2 }
 0x2d5   : > { %v1350_v58 = vadd.f32 %v1349_v4, %v2860_v36 }
 0x2d6   : > { %1553 = vmatpush.bf16.msrb.mxu0 %v1473_v16 }
 0x2d7   : > { %v1385_v7 = vpop.f32.mrf.mxu3 }
 0x2d8   : > { %v1386_v63 = vadd.f32 %v1385_v7, %v1337_v21 }
 0x2da   : > { %v1426_v55 = vmax.f32 %v1386_v63, 0.0  ;;  %1554 = vmatpush.bf16.msrb.mxu0 %v1471_v1 }
 0x2dc   : > { %v2919_v39 = vpack.c.bf16 %v1426_v55, %v1424_v49  ;;  %v1351_v2 = vpop.f32.mrf.mxu2 }
 0x2dd   : > { %v1352_v34 = vadd.f32 %v1351_v2, %v2866_v31  ;;  %v2010_v31 = vld [vmem:[%s3014_s5 + $0x18] sm:$0xff] }
 0x2de   : > { %1555 = vmatpush.bf16.msrb.mxu0 %v1469_v23 }
 0x2df   : > { %v1388_v46 = vpop.f32.mrf.mxu3 }
 0x2e0   : > { %v1389_v56 = vadd.f32 %v1388_v46, %v1340_v26 }
 0x2e2   : > { %1556 = vmatpush.bf16.msrb.mxu0 %v2900_v42  ;;  %v1428_v14 = vmax.f32 %v1389_v56, 0.0 }
 0x2e4   : > { %v1354_v15 = vpop.f32.mrf.mxu2 }
 0x2e5   : > { %v1355_v9 = vadd.f32 %v1354_v15, %v2856_v28 }
 0x2e6   : > { %1557 = vmatpush.bf16.msrb.mxu0 %v2895_v3 }
 0x2e7   : > { %v1390_v48 = vpop.f32.mrf.mxu3 }
 0x2e8   : > { %v1391_v37 = vadd.f32 %v1390_v48, %v1342_v18 }
 0x2ea   : > { %v1430_v11 = vmax.f32 %v1391_v37, 0.0  ;;  %1558 = vmatpush.bf16.msrb.mxu0 %v2886_v25 }
 0x2ec   : > { %v2931_v23 = vpack.c.bf16 %v1430_v11, %v1428_v14  ;;  %v1356_v35 = vpop.f32.mrf.mxu2 }
 0x2ed   : > { %1559 = vmatmul.bf16.vlgmr.msrb.gmra.mxu0 %v2928_v62 }
 0x2ef   : > { %v1393_v42 = vpop.f32.mrf.mxu3 }
 0x2f0   : > { %v1394_v3 = vadd.f32 %v1393_v42, %v1345_v33 }
 0x2f2   : > { %v1432_v8 = vmax.f32 %v1394_v3, 0.0 }
 0x2f4   : > { %v1359_v54 = vpop.f32.mrf.mxu2 }
 0x2f5   : > { %v1360_v4 = vadd.f32 %v1359_v54, %v2870_v6 }
 0x2f7   : > { %v1395_v51 = vpop.f32.mrf.mxu3 }
 0x2f8   : > { %v1396_v61 = vadd.f32 %v1395_v51, %v1347_v53 }
 0x2fa   : > { %v1434_v25 = vmax.f32 %v1396_v61, 0.0 }
 0x2fc   : > { %v2941_v27 = vpack.c.bf16 %v1434_v25, %v1432_v8  ;;  %v1361_v19 = vpop.f32.mrf.mxu2 }
 0x2fd   : > { %1564 = vmatmul.bf16.gmra.mxu0 %v2939_v10  ;;  %v1362_v56 = vadd.f32 %v1361_v19, %v2848_v44 }
 0x2ff   : > { %v1398_v50 = vpop.f32.mrf.mxu3 }
 0x300   : > { %v1399_v24 = vadd.f32 %v1398_v50, %v1350_v58  ;;  %v1525_v50 = vpop.permute.xlu1 %1524 }
 0x302   : > { %v1436_v57 = vmax.f32 %v1399_v24, 0.0  ;;  %v1520_v24 = vpop.permute.xlu0 %1519 }
 0x304   : > { %v1364_v20 = vpop.f32.mrf.mxu2 }
 0x305   : > { %v1365_v26 = vadd.f32 %v1364_v20, %v2834_v0 }
 0x307   : > { %v1400_v38 = vpop.f32.mrf.mxu3 }
 0x308   : > { %v1401_v59 = vadd.f32 %v1400_v38, %v1352_v34 }
 0x30a   : > { %v1438_v30 = vmax.f32 %v1401_v59, 0.0  ;;  %v1515_v38 = vpop.permute.xlu0 %1514 }
 0x30c   : > { %v1470_v52 = vpack.c.bf16 %v1438_v30, %v1436_v57  ;;  %v1366_v60 = vpop.f32.mrf.mxu2 }
 0x30d   : > { %1569 = vmatmul.bf16.gmra.mxu0 %v2949_v22  ;;  %v1367_v63 = vadd.f32 %v1366_v60, %v2846_v47  ;;  %v1357_v47 = vadd.f32 %v1356_v35, %v2878_v12 }
 0x30f   : > { %v1403_v36 = vpop.f32.mrf.mxu3 }
 0x310   : > { %v1404_v41 = vadd.f32 %v1403_v36, %v1355_v9 }
 0x312   : > { %v1440_v51 = vmax.f32 %v1404_v41, 0.0  ;;  %v1490_v20 = vpop.permute.xlu0 %1489 }
 0x314   : > { %v1369_v21 = vpop.f32.mrf.mxu2 }
 0x315   : > { %v1370_v28 = vadd.f32 %v1369_v21, %v2832_v32 }
 0x317   : > { %v1405_v40 = vpop.f32.mrf.mxu3 }
 0x318   : > { %v1406_v42 = vadd.f32 %v1405_v40, %v1357_v47 }
 0x31a   : > { %v1442_v53 = vmax.f32 %v1406_v42, 0.0 }
 0x31c   : > { %v1371_v7 = vpop.f32.mrf.mxu2  ;;  %v1472_v61 = vpack.c.bf16 %v1442_v53, %v1440_v51 }
 0x31d   : > { %1574 = vmatmul.bf16.gmra.mxu0 %v2010_v31  ;;  %v1372_v1 = vadd.f32 %v1371_v7, %v2864_v45  ;;  %v1625_v7 = vld [vmem:[%s3016_s7] sm:$0x1] }
 0x31f   : > { %v1408_v29 = vpop.f32.mrf.mxu3 }
 0x320   : > { %v1409_v33 = vadd.f32 %v1408_v29, %v1360_v4 }
 0x322   : > { %v1444_v2 = vmax.f32 %v1409_v33, 0.0 }
 0x327   : > { %v1410_v13 = vpop.f32.mrf.mxu3 }
 0x328   : > { %v1411_v14 = vadd.f32 %v1410_v13, %v1362_v56 }
 0x32a   : > { %v1446_v3 = vmax.f32 %v1411_v14, 0.0 }
 0x32c   : > { %v1474_v44 = vpack.c.bf16 %v1446_v3, %v1444_v2 }
 0x32f   : > { %v1413_v16 = vpop.f32.mrf.mxu3 }
 0x330   : > { %v1414_v18 = vadd.f32 %v1413_v16, %v1365_v26 }
 0x332   : > { %v1448_v45 = vmax.f32 %v1414_v18, 0.0 }
 0x337   : > { %v1415_v17 = vpop.f32.mrf.mxu3 }
 0x338   : > { %v1416_v5 = vadd.f32 %v1415_v17, %v1367_v63 }
 0x33a   : > { %v1450_v11 = vmax.f32 %v1416_v5, 0.0 }
 0x33c   : > { %v1476_v0 = vpack.c.bf16 %v1450_v11, %v1448_v45 }
 0x33f   : > { %v1418_v43 = vpop.f32.mrf.mxu3 }
 0x340   : > { %v1419_v49 = vadd.f32 %v1418_v43, %v1370_v28 }
 0x342   : > { %v1452_v48 = vmax.f32 %v1419_v49, 0.0 }
 0x347   : > { %v1420_v55 = vpop.f32.mrf.mxu3 }
 0x348   : > { %v1421_v46 = vadd.f32 %v1420_v55, %v1372_v1 }
 0x34a   : > { %v1454_v37 = vmax.f32 %v1421_v46, 0.0 }
 0x34c   : > { %v1478_v32 = vpack.c.bf16 %v1454_v37, %v1452_v48 }
 0x34e   : > { %1580 = vmatpush.bf16.msrb.mxu1 %v1478_v32 }
 0x352   : > { %1581 = vmatpush.bf16.msrb.mxu1 %v1476_v0 }
 0x356   : > { %1582 = vmatpush.bf16.msrb.mxu1 %v1474_v44 }
 0x35a   : > { %1583 = vmatpush.bf16.msrb.mxu1 %v1472_v61 }
 0x35e   : > { %1584 = vmatpush.bf16.msrb.mxu1 %v1470_v52 }
 0x362   : > { %1585 = vmatpush.bf16.msrb.mxu1 %v2941_v27  ;;  %v1510_v27 = vpop.permute.xlu2 %1509 }
 0x366   : > { %1586 = vmatpush.bf16.msrb.mxu1 %v2931_v23  ;;  %v1500_v23 = vpop.permute.xlu1 %1499 }
 0x36a   : > { %v1560_v6 = vpop.f32.mrf.mxu0  ;;  %1587 = vmatpush.bf16.msrb.mxu1 %v2919_v39 }
 0x36b   : > { %v1561_v13 = vadd.f32 %v1560_v6, %v1490_v20 }
 0x36d   : > { %1588 = vmatmul.bf16.vlgmr.msrb.gmra.mxu1 %v2928_v62  ;;  %v1609_v21 = vmax.f32 %v1561_v13, 0.0 }
 0x36e   : > { %v1495_v40 = vpop.permute.xlu1 %1494 }
 0x372   : > { %v1562_v12 = vpop.f32.mrf.mxu0 }
 0x373   : > { %v1563_v19 = vadd.f32 %v1562_v12, %v1495_v40 }
 0x375   : > { %v1611_v16 = vmax.f32 %v1563_v19, 0.0 }
 0x377   : > { %v1626_v43 = vpack.c.bf16 %v1611_v16, %v1609_v21 }
 0x37a   : > { %v1565_v8 = vpop.f32.mrf.mxu0 }
 0x37d   : > { %1593 = vmatmul.bf16.gmra.mxu1 %v2939_v10  ;;  %v1505_v10 = vpop.permute.xlu2 %1504 }
 0x382   : > { %v1567_v25 = vpop.f32.mrf.mxu0 }
 0x383   : > { %v1568_v9 = vadd.f32 %v1567_v25, %v1505_v10 }
 0x385   : > { %v1615_v29 = vmax.f32 %v1568_v9, 0.0  ;;  %v1638_v25 = vpop.permute.xlu2 %1637 }
 0x38a   : > { %v1570_v15 = vpop.f32.mrf.mxu0 }
 0x38b   : > { %v1571_v57 = vadd.f32 %v1570_v15, %v1510_v27  ;;  %v1640_v15 = vperm.slane %v1638_v25, 0 }
 0x38d   : > { %1598 = vmatmul.bf16.gmra.mxu1 %v2949_v22  ;;  %v1566_v22 = vadd.f32 %v1565_v8, %v1500_v23  ;;  %v1617_v54 = vmax.f32 %v1571_v57, 0.0 }
 0x38f   : > { %v1613_v60 = vmax.f32 %v1566_v22, 0.0 }
 0x391   : > { %v1628_v17 = vpack.c.bf16 %v1615_v29, %v1613_v60 }
 0x392   : > { %v1572_v58 = vpop.f32.mrf.mxu0 }
 0x393   : > { %v1573_v59 = vadd.f32 %v1572_v58, %v1515_v38  ;;  %v1677_v58 = vlaneseq }
 0x395   : > { %v1619_v36 = vmax.f32 %v1573_v59, 0.0  ;;  %vm1679_vm3 = vcmp.lt.s32.totalorder %v1677_v58, 256 }
 0x39a   : > { %v1575_v34 = vpop.f32.mrf.mxu0 }
 0x39b   : > { %v1576_v35 = vadd.f32 %v1575_v34, %v1520_v24 }
 0x39d   : > { %1603 = vmatmul.bf16.gmra.mxu1 %v2010_v31  ;;  %v1621_v30 = vmax.f32 %v1576_v35, 0.0  ;;  %v1630_v31 = vpack.c.bf16 %v1619_v36, %v1617_v54 }
 0x3a2   : > { %v1577_v39 = vpop.f32.mrf.mxu0 }
 0x3a3   : > { %v1578_v62 = vadd.f32 %v1577_v39, %v1525_v50 }
 0x3a5   : > { %v1623_v52 = vmax.f32 %v1578_v62, 0.0 }
 0x3a7   : > { %v1632_v41 = vpack.c.bf16 %v1623_v52, %v1621_v30 }
 0x3a9   : > { %1649 = vmatpush.bf16.msra.mxu2 %v1632_v41 }
 0x3ad   : > { %1650 = vmatpush.bf16.msra.mxu2 %v1630_v31 }
 0x3b1   : > { %1651 = vmatpush.bf16.msra.mxu2 %v1628_v17 }
 0x3b5   : > { %1652 = vmatpush.bf16.msra.mxu2 %v1626_v43 }
 0x3b8   : > { %1964 = vmatmul.msk.bf16.vlgmr.msra.gmra.mxu2 %vm1641_vm1, %v1625_v7 }
 0x3ea   : > { %v1589_v28 = vpop.f32.mrf.mxu1 }
 0x3eb   : > { %v1590_v2 = vadd.f32 %v1589_v28, %v1490_v20 }
 0x3ed   : > { %v1610_v61 = vmax.f32 %v1590_v2, 0.0 }
 0x3f2   : > { %v1591_v63 = vpop.f32.mrf.mxu1 }
 0x3f3   : > { %v1592_v42 = vadd.f32 %v1591_v63, %v1495_v40 }
 0x3f5   : > { %v1612_v44 = vmax.f32 %v1592_v42, 0.0 }
 0x3f7   : > { %v1627_v6 = vpack.c.bf16 %v1612_v44, %v1610_v61 }
 0x3fa   : > { %v1594_v1 = vpop.f32.mrf.mxu1 }
 0x3fb   : > { %v1595_v33 = vadd.f32 %v1594_v1, %v1500_v23 }
 0x3fd   : > { %v1614_v53 = vmax.f32 %v1595_v33, 0.0 }
 0x402   : > { %v1596_v49 = vpop.f32.mrf.mxu1 }
 0x403   : > { %v1597_v11 = vadd.f32 %v1596_v49, %v1505_v10 }
 0x405   : > { %v1616_v3 = vmax.f32 %v1597_v11, 0.0 }
 0x407   : > { %v1629_v51 = vpack.c.bf16 %v1616_v3, %v1614_v53 }
 0x40a   : > { %v1599_v55 = vpop.f32.mrf.mxu1 }
 0x40b   : > { %v1600_v37 = vadd.f32 %v1599_v55, %v1510_v27 }
 0x40d   : > { %v1618_v45 = vmax.f32 %v1600_v37, 0.0 }
 0x412   : > { %v1601_v26 = vpop.f32.mrf.mxu1 }
 0x413   : > { %v1602_v18 = vadd.f32 %v1601_v26, %v1515_v38 }
 0x415   : > { %v1620_v32 = vmax.f32 %v1602_v18, 0.0 }
 0x417   : > { %v1631_v0 = vpack.c.bf16 %v1620_v32, %v1618_v45 }
 0x41a   : > { %v1604_v5 = vpop.f32.mrf.mxu1 }
 0x41b   : > { %v1605_v46 = vadd.f32 %v1604_v5, %v1520_v24 }
 0x41d   : > { %v1622_v4 = vmax.f32 %v1605_v46, 0.0 }
 0x422   : > { %v1606_v56 = vpop.f32.mrf.mxu1 }
 0x423   : > { %v1607_v48 = vadd.f32 %v1606_v56, %v1525_v50 }
 0x425   : > { %v1624_v14 = vmax.f32 %v1607_v48, 0.0 }
 0x427   : > { %v1633_v47 = vpack.c.bf16 %v1624_v14, %v1622_v4 }
 0x429   : > { %1662 = vmatpush.bf16.msra.mxu3 %v1633_v47 }
 0x42d   : > { %1663 = vmatpush.bf16.msra.mxu3 %v1631_v0 }
 0x431   : > { %1664 = vmatpush.bf16.msra.mxu3 %v1629_v51 }
 0x435   : > { %1665 = vmatpush.bf16.msra.mxu3 %v1627_v6 }
 0x438   : > { %1965 = vmatmul.msk.bf16.vlgmr.msra.gmra.mxu3 %vm1641_vm1, %v1625_v7 }
 0x43b   : > { %v1654_v12 = vpop.f32.mrf.mxu2 }
 0x43c   : > { %v1655_v34 = vadd.f32 %v1654_v12, %v1640_v15 }
 0x443   : > { %v1656_v8 = vpop.f32.mrf.mxu2 }
 0x4bb   : > { %v1667_v50 = vpop.f32.mrf.mxu3 }
 0x4bc   : > { %v1668_v24 = vadd.f32 %v1667_v50, %v1640_v15 }
 0x4be   : > { %v1673_v27 = vrot.slane %v1668_v24, 7 }
 0x4c0   : > { %v1675_v23 = vsel %vm1674_vm2, %v1655_v34, %v1673_v27 }
 0x4c1   : > { %1681 = vst.msk [vmem:[%s380_s26] sm:$0x3] %vm1679_vm3, %v1675_v23 }
 0x4c2   : > { %2081 = shalt.err (!%p2078_p5)
}
 0x4c3   : > { %2011 = dma.vmem_to_hbm [thread:$0]  (%p2210_p6), %s1696_s27, 32, %s1698_s28, %s1683_s8   ;;  %v1669_v35 = vpop.f32.mrf.mxu3 }
 0x4c4 PF: > { %s1709_s22 = sand.u32 1, %s2104_s11   ;;  %p2014_p7 = pnand %p1765_p9, %p2214_p8 }
 0x4c5   : > { %s1710_s24 = scalar_lea.sflag [#allocation5], %s1709_s22 }
 0x4c6   : > { %p2015_p10 = pneg %p2014_p7 }
 0x4c8   : > { %2099 = dma.done.wait (%p2015_p10), %s1710_s24, 32  }
 0x4c9   : > { %2101 = vsyncadd (%p2015_p10), %s1710_s24, 4294967264  ;;  %p21_p11 = scmp.ge.s32.totalorder %s2195_s16, 4   ;;  %s3021_s11 = smov %s2108_s12 }
 0x4ca   : > { %s3022_s12 = smov %s2112_s13  ;;  %s3023_s13 = smov %s2208_s19 }
 0x4cb   : > { %s3024_s14 = smov %s2195_s16  ;;  %23 = sbr.rel (!%p21_p11) target bundleno = 6 (0x6), region = 134 }
 0x4d0   :  { %1716 = vsyncpa [#allocation5], 1 }
 0x4d1   :  { %1718 = vsyncpa [#allocation5 + $0x1], 1 }

</bundles_post_ra>
